<compile_context>
chip_gen: v7x
topology: tpu7x:2x2x1
jax: 0.10.0
libtpu: 0.0.40
codegen_flags: <defaults>
</compile_context>

<pallas_src>
import jax
import jax.numpy as jnp
from jax.experimental import pallas as pl
from jax.experimental.pallas import tpu as pltpu

# ----------------------------- configuration (small synthetic BERT) -------------------
B, S, H = 2, 8, 32            # batch, seq_len, hidden_size
NUM_HEADS, HEAD_DIM = 2, 16   # H = NUM_HEADS * HEAD_DIM
FFN = 4 * H                   # BERT intermediate size
VOCAB, MAX_POS = 50, 16
NUM_LAYERS = 2
NUM_LABELS = 3
PAD_LABELS = 128              # lane-dense classifier output width
LN_EPS = 1e-12
SCALE = 1.0 / (HEAD_DIM ** 0.5)

# ----- packed small-parameter layout (one lane-dense (PACK_ROWS, 128) array) ----------
PACK_W = 128
R_CLS_W = 0                       # rows [0, H): padded classifier weight (H, 128)
R_CLS_B = H                       # classifier bias (padded to 128)
R_EMB_G = H + 1                   # embedding LN gamma
R_EMB_B = H + 2                   # embedding LN beta
R_LAYER = H + 3                   # first per-layer row
ROWS_PER_LAYER = 8                # bqkv, bo, b1, b2, g1, be1, g2, be2
PACK_ROWS = R_LAYER + ROWS_PER_LAYER * NUM_LAYERS


# ----------------------------- in-kernel helpers --------------------------------------
def _layernorm(x, gamma, beta):
    mu = jnp.mean(x, axis=-1, keepdims=True)
    var = jnp.mean(jnp.square(x - mu), axis=-1, keepdims=True)
    return (x - mu) * jax.lax.rsqrt(var + LN_EPS) * gamma + beta


# ----------------------------- fused Pallas kernel ------------------------------------
def bert_fused_kernel(emb_ref, mask_ref, pack_ref, wqkv_ref, wo_ref, w1_ref, w2_ref,
                      out_ref):
    # Each grid step processes one batch element: emb_ref is (S, H), mask_ref is (1, S).
    pack = pack_ref  # (PACK_ROWS, 128) small-parameter pack, VMEM-resident

    eg = pack[R_EMB_G:R_EMB_G + 1, :H]                  # (1, H)
    eb = pack[R_EMB_B:R_EMB_B + 1, :H]
    x = _layernorm(emb_ref[...], eg, eb)                # (S, H)

    bias = mask_ref[...][None, :, :]                    # (1, 1, S) additive attention mask

    for l in range(NUM_LAYERS):                         # static unroll; weights VMEM-resident
        base = R_LAYER + ROWS_PER_LAYER * l
        bqkv = pack[base + 0:base + 1, :3 * H]          # (1, 3H)
        bo = pack[base + 1:base + 2, :H]
        b1 = pack[base + 2:base + 3, :FFN]
        b2 = pack[base + 3:base + 4, :H]
        g1 = pack[base + 4:base + 5, :H]
        be1 = pack[base + 5:base + 6, :H]
        g2 = pack[base + 6:base + 7, :H]
        be2 = pack[base + 7:base + 8, :H]

        # ---- fused QKV projection: one [S,H] x [H,3H] matmul ----
        qkv = jnp.dot(x, wqkv_ref[l], preferred_element_type=jnp.float32) + bqkv  # (S, 3H)
        q = qkv[:, 0 * H:1 * H].reshape(S, NUM_HEADS, HEAD_DIM)
        k = qkv[:, 1 * H:2 * H].reshape(S, NUM_HEADS, HEAD_DIM)
        v = qkv[:, 2 * H:3 * H].reshape(S, NUM_HEADS, HEAD_DIM)

        # ---- attention with head-batched einsums (no per-head Python loop / concats) ----
        scores = jnp.einsum('qhd,khd->hqk', q, k,
                            preferred_element_type=jnp.float32) * SCALE + bias   # (NH, S, S)
        m = jnp.max(scores, axis=-1, keepdims=True)
        p = jnp.exp(scores - m)
        p = p / jnp.sum(p, axis=-1, keepdims=True)       # exact softmax (not VALU-bound)
        ctx = jnp.einsum('hqk,khd->qhd', p, v,
                         preferred_element_type=jnp.float32).reshape(S, H)        # (S, H)

        attn_out = jnp.dot(ctx, wo_ref[l], preferred_element_type=jnp.float32) + bo
        x = _layernorm(x + attn_out, g1, be1)

        hdn = jax.nn.gelu(
            jnp.dot(x, w1_ref[l], preferred_element_type=jnp.float32) + b1,
            approximate=True)
        ffn = jnp.dot(hdn, w2_ref[l], preferred_element_type=jnp.float32) + b2
        x = _layernorm(x + ffn, g2, be2)

    # dropout(p=0.1) is identity in eval; classifier writes a lane-dense 128-wide slab
    cls_w = pack[R_CLS_W:R_CLS_W + H, :]                 # (H, 128), sublane-aligned slice
    cls_b = pack[R_CLS_B:R_CLS_B + 1, :]                 # (1, 128)
    out_ref[...] = jnp.dot(x, cls_w, preferred_element_type=jnp.float32) + cls_b


# ----------------------------- one-time parameter packing (outside jit) ---------------
def pack_params(params):
    """Stack per-layer matmul weights and pack all small params into one lane-dense array.

    Called ONCE at parameter-load time (hoisted out of the jitted forward so weights are
    not re-read/re-written in HBM on every call)."""
    layers = params["layers"]
    wqkv = jnp.stack(
        [jnp.concatenate([l["attn_w"][0], l["attn_w"][1], l["attn_w"][2]], axis=-1)
         for l in layers])                                                  # (L, H, 3H)
    wo = jnp.stack([l["attn_w"][3] for l in layers])                        # (L, H, H)
    w1 = jnp.stack([l["w1"] for l in layers])                               # (L, H, FFN)
    w2 = jnp.stack([l["w2"] for l in layers])                               # (L, FFN, H)

    def row(vec):
        v = jnp.asarray(vec, jnp.float32).reshape(-1)
        return jnp.zeros((1, PACK_W), jnp.float32).at[0, :v.shape[0]].set(v)

    rows = [jnp.zeros((H, PACK_W), jnp.float32).at[:, :NUM_LABELS].set(params["cls_w"]),
            row(params["cls_b"]),
            row(params["emb_ln"][0]),
            row(params["emb_ln"][1])]
    for l in layers:
        rows.append(row(jnp.concatenate([l["attn_b"][0], l["attn_b"][1], l["attn_b"][2]])))
        rows.append(row(l["attn_b"][3]))
        rows.append(row(l["b1"]))
        rows.append(row(l["b2"]))
        rows.append(row(l["ln"][0]))
        rows.append(row(l["ln"][1]))
        rows.append(row(l["ln"][2]))
        rows.append(row(l["ln"][3]))
    pack = jnp.concatenate(rows, axis=0)
    assert pack.shape == (PACK_ROWS, PACK_W), pack.shape

    return {"wqkv": wqkv, "wo": wo, "w1": w1, "w2": w2, "pack": pack,
            "word_emb": params["word_emb"], "pos_emb": params["pos_emb"],
            "type_emb": params["type_emb"]}


def _cost_estimate():
    per_layer_flops = (2 * S * H * 3 * H                      # QKV projection
                       + 2 * 2 * NUM_HEADS * S * S * HEAD_DIM  # scores + context
                       + 2 * S * H * H                         # output projection
                       + 2 * 2 * S * H * FFN)                  # FFN up + down
    flops = B * (NUM_LAYERS * per_layer_flops + 2 * S * H * PAD_LABELS)
    transcendentals = B * (NUM_LAYERS * (NUM_HEADS * S * S + S * FFN)
                           + (2 * NUM_LAYERS + 1) * S)
    bytes_accessed = 4 * (B * S * H + B * S + PACK_ROWS * PACK_W
                          + NUM_LAYERS * (H * 3 * H + H * H + 2 * H * FFN)
                          + B * S * PAD_LABELS)
    return pl.CostEstimate(flops=flops, transcendentals=transcendentals,
                           bytes_accessed=bytes_accessed)


# ----------------------------- full forward (Bert_Model, labels=None path) ------------
def bert_model_forward(packed, input_ids, attention_mask):
    # embedding gather is plain-JAX glue (data-dependent gather)
    word = packed["word_emb"][input_ids]                            # (B, S, H)
    pos = packed["pos_emb"][jnp.arange(S)][None, :, :]              # (1, S, H)
    tok = packed["type_emb"][0][None, None, :]                      # token_type_ids == 0
    emb = word + pos + tok                                          # (B, S, H)

    mask_bias = (1.0 - attention_mask.astype(jnp.float32))[:, None, :] * -10000.0  # (B,1,S)

    out = pl.pallas_call(
        bert_fused_kernel,
        out_shape=jax.ShapeDtypeStruct((B, S, PAD_LABELS), jnp.float32),
        grid=(B,),
        in_specs=[
            pl.BlockSpec((None, S, H), lambda b: (b, 0, 0)),                 # emb (per batch)
            pl.BlockSpec((None, 1, S), lambda b: (b, 0, 0)),                 # mask (per batch)
            pl.BlockSpec((PACK_ROWS, PACK_W), lambda b: (0, 0)),             # small-param pack
            pl.BlockSpec((NUM_LAYERS, H, 3 * H), lambda b: (0, 0, 0)),       # Wqkv
            pl.BlockSpec((NUM_LAYERS, H, H), lambda b: (0, 0, 0)),           # Wo
            pl.BlockSpec((NUM_LAYERS, H, FFN), lambda b: (0, 0, 0)),         # W1
            pl.BlockSpec((NUM_LAYERS, FFN, H), lambda b: (0, 0, 0)),         # W2
        ],
        out_specs=pl.BlockSpec((None, S, PAD_LABELS), lambda b: (b, 0, 0)),
        compiler_params=pltpu.CompilerParams(
            dimension_semantics=("parallel",)),      # shards batch across v7x's 2 TCs
        cost_estimate=_cost_estimate(),
    )(emb, mask_bias, packed["pack"], packed["wqkv"], packed["wo"],
      packed["w1"], packed["w2"])

    return out[:, :, :NUM_LABELS]


# ----------------------------- pure-JAX reference (for correctness check) -------------
def reference_forward(params, input_ids, attention_mask):
    def ln_(x, g, b):
        mu = jnp.mean(x, -1, keepdims=True)
        var = jnp.mean(jnp.square(x - mu), -1, keepdims=True)
        return (x - mu) * jax.lax.rsqrt(var + LN_EPS) * g + b

    word = params["word_emb"][input_ids]
    pos = params["pos_emb"][jnp.arange(S)][None, :, :]
    tok = params["type_emb"][0][None, None, :]
    x = ln_(word + pos + tok, params["emb_ln"][0], params["emb_ln"][1])
    bias = (1.0 - attention_mask.astype(jnp.float32))[:, None, None, :] * -10000.0

    for layer in params["layers"]:
        q = x @ layer["attn_w"][0] + layer["attn_b"][0]
        k = x @ layer["attn_w"][1] + layer["attn_b"][1]
        v = x @ layer["attn_w"][2] + layer["attn_b"][2]
        qh = q.reshape(B, S, NUM_HEADS, HEAD_DIM).transpose(0, 2, 1, 3)
        kh = k.reshape(B, S, NUM_HEADS, HEAD_DIM).transpose(0, 2, 1, 3)
        vh = v.reshape(B, S, NUM_HEADS, HEAD_DIM).transpose(0, 2, 1, 3)
        scores = jnp.einsum("bhqd,bhkd->bhqk", qh, kh) * SCALE + bias
        p = jax.nn.softmax(scores, axis=-1)
        ctx = jnp.einsum("bhqk,bhkd->bhqd", p, vh).transpose(0, 2, 1, 3).reshape(B, S, H)
        attn = ctx @ layer["attn_w"][3] + layer["attn_b"][3]
        x = ln_(x + attn, layer["ln"][0], layer["ln"][1])
        hdn = jax.nn.gelu(x @ layer["w1"] + layer["b1"], approximate=True)
        ffn = hdn @ layer["w2"] + layer["b2"]
        x = ln_(x + ffn, layer["ln"][2], layer["ln"][3])
    return x @ params["cls_w"] + params["cls_b"]


# ----------------------------- deterministic parameter init ---------------------------
def init_params(key):
    keys = iter(jax.random.split(key, 64))
    sc = 0.05

    def rnd(shape, s=sc):
        return s * jax.random.normal(next(keys), shape, jnp.float32)

    params = {
        "word_emb": rnd((VOCAB, H)),
        "pos_emb": rnd((MAX_POS, H)),
        "type_emb": rnd((2, H)),
        "emb_ln": jnp.stack([1.0 + rnd((H,), 0.1), rnd((H,), 0.1)]),     # (2, H)
        "layers": [],
    }
    for _ in range(NUM_LAYERS):
        params["layers"].append({
            "attn_w": rnd((4, H, H)),                                    # q, k, v, o
            "attn_b": rnd((4, H), 0.02),
            "ln": jnp.stack([1.0 + rnd((H,), 0.1), rnd((H,), 0.1),
                             1.0 + rnd((H,), 0.1), rnd((H,), 0.1)]),     # (4, H)
            "w1": rnd((H, FFN)),
            "b1": rnd((1, FFN), 0.02),
            "w2": rnd((FFN, H)),
            "b2": rnd((1, H), 0.02),
        })
    params["cls_w"] = rnd((H, NUM_LABELS))
    params["cls_b"] = rnd((1, NUM_LABELS), 0.02)
    return params


# ----------------------------- main ----------------------------------------------------
if __name__ == "__main__":
    key = jax.random.PRNGKey(0)
    pkey, ikey = jax.random.split(key)
    params = init_params(pkey)
    packed = pack_params(params)    # one-time repack, hoisted out of the jitted forward

    input_ids = jax.random.randint(ikey, (B, S), 0, VOCAB, dtype=jnp.int32)
    attention_mask = jnp.ones((B, S), jnp.int32).at[1, 6:].set(0)        # pad tail of batch 1

    forward = jax.jit(bert_model_forward)
    logits = forward(packed, input_ids, attention_mask)
    logits = jax.block_until_ready(logits)
    assert logits.shape == (B, S, NUM_LABELS), logits.shape

    ref = reference_forward(params, input_ids, attention_mask)
    if not jnp.allclose(logits, ref, atol=1e-4, rtol=1e-4):
        raise AssertionError(
            f"Pallas output mismatch: max abs err {jnp.max(jnp.abs(logits - ref))}")

    print("KERNEL_OK")
</pallas_src>

<mosaic_0001>
module attributes {stable_mosaic.version = 11 : i64} {
  func.func @bert_fused_kernel(%arg0: i32, %arg1: memref<1x8x32xf32, #tpu.memory_space<vmem>>, %arg2: memref<1x1x8xf32, #tpu.memory_space<vmem>>, %arg3: memref<51x128xf32, #tpu.memory_space<vmem>>, %arg4: memref<2x32x96xf32, #tpu.memory_space<vmem>>, %arg5: memref<2x32x32xf32, #tpu.memory_space<vmem>>, %arg6: memref<2x32x128xf32, #tpu.memory_space<vmem>>, %arg7: memref<2x128x32xf32, #tpu.memory_space<vmem>>, %arg8: memref<1x8x128xf32, #tpu.memory_space<vmem>>) attributes {dimension_semantics = [#tpu.dimension_semantics<parallel>], iteration_bounds = array<i64: 2>, scalar_prefetch = 0 : i64, scratch_operands = 0 : i64, tpu.core_type = #tpu.core_type<tc>, window_params = [{transform_indices = @transform_0, window_bounds = array<i64: 1, 8, 32>}, {transform_indices = @transform_1, window_bounds = array<i64: 1, 1, 8>}, {pipeline_mode = #tpu.pipeline_mode<synchronous>, transform_indices = @transform_2, window_bounds = array<i64: 51, 128>}, {pipeline_mode = #tpu.pipeline_mode<synchronous>, transform_indices = @transform_3, window_bounds = array<i64: 2, 32, 96>}, {pipeline_mode = #tpu.pipeline_mode<synchronous>, transform_indices = @transform_4, window_bounds = array<i64: 2, 32, 32>}, {pipeline_mode = #tpu.pipeline_mode<synchronous>, transform_indices = @transform_5, window_bounds = array<i64: 2, 32, 128>}, {pipeline_mode = #tpu.pipeline_mode<synchronous>, transform_indices = @transform_6, window_bounds = array<i64: 2, 128, 32>}, {transform_indices = @transform_7, window_bounds = array<i64: 1, 8, 128>}]} {
    %c33 = arith.constant 33 : index
    %c0 = arith.constant 0 : index
    %0 = vector.load %arg3[%c33, %c0] : memref<51x128xf32, #tpu.memory_space<vmem>>, vector<1x32xf32>
    %c34 = arith.constant 34 : index
    %c0_0 = arith.constant 0 : index
    %1 = vector.load %arg3[%c34, %c0_0] : memref<51x128xf32, #tpu.memory_space<vmem>>, vector<1x32xf32>
    %c0_1 = arith.constant 0 : index
    %c0_2 = arith.constant 0 : index
    %c0_3 = arith.constant 0 : index
    %2 = vector.load %arg1[%c0_1, %c0_2, %c0_3] : memref<1x8x32xf32, #tpu.memory_space<vmem>>, vector<1x8x32xf32>
    %3 = vector.shape_cast %2 : vector<1x8x32xf32> to vector<8x32xf32>
    %cst = arith.constant dense<0.000000e+00> : vector<8xf32>
    %4 = vector.multi_reduction <add>, %3, %cst [1] : vector<8x32xf32> to vector<8xf32>
    %5 = vector.shape_cast %4 : vector<8xf32> to vector<8x1xf32>
    %cst_4 = arith.constant 3.200000e+01 : f32
    %6 = vector.broadcast %cst_4 : f32 to vector<8x1xf32>
    %7 = arith.divf %5, %6 : vector<8x1xf32>
    %8 = vector.broadcast %7 : vector<8x1xf32> to vector<8x32xf32>
    %9 = arith.subf %3, %8 : vector<8x32xf32>
    %10 = arith.mulf %9, %9 : vector<8x32xf32>
    %cst_5 = arith.constant dense<0.000000e+00> : vector<8xf32>
    %11 = vector.multi_reduction <add>, %10, %cst_5 [1] : vector<8x32xf32> to vector<8xf32>
    %12 = vector.shape_cast %11 : vector<8xf32> to vector<8x1xf32>
    %cst_6 = arith.constant 3.200000e+01 : f32
    %13 = vector.broadcast %cst_6 : f32 to vector<8x1xf32>
    %14 = arith.divf %12, %13 : vector<8x1xf32>
    %15 = vector.broadcast %7 : vector<8x1xf32> to vector<8x32xf32>
    %16 = arith.subf %3, %15 : vector<8x32xf32>
    %cst_7 = arith.constant 9.99999996E-13 : f32
    %17 = vector.broadcast %cst_7 : f32 to vector<8x1xf32>
    %18 = arith.addf %14, %17 : vector<8x1xf32>
    %19 = math.rsqrt %18 : vector<8x1xf32>
    %20 = vector.broadcast %19 : vector<8x1xf32> to vector<8x32xf32>
    %21 = arith.mulf %16, %20 : vector<8x32xf32>
    %22 = vector.broadcast %0 : vector<1x32xf32> to vector<8x32xf32>
    %23 = arith.mulf %21, %22 : vector<8x32xf32>
    %24 = vector.broadcast %1 : vector<1x32xf32> to vector<8x32xf32>
    %25 = arith.addf %23, %24 : vector<8x32xf32>
    %c0_8 = arith.constant 0 : index
    %c0_9 = arith.constant 0 : index
    %c0_10 = arith.constant 0 : index
    %26 = vector.load %arg2[%c0_8, %c0_9, %c0_10] : memref<1x1x8xf32, #tpu.memory_space<vmem>>, vector<1x1x8xf32>
    %27 = vector.shape_cast %26 : vector<1x1x8xf32> to vector<1x8xf32>
    %28 = vector.shape_cast %27 : vector<1x8xf32> to vector<1x1x8xf32>
    %c35 = arith.constant 35 : index
    %c0_11 = arith.constant 0 : index
    %29 = vector.load %arg3[%c35, %c0_11] : memref<51x128xf32, #tpu.memory_space<vmem>>, vector<1x96xf32>
    %c36 = arith.constant 36 : index
    %c0_12 = arith.constant 0 : index
    %30 = vector.load %arg3[%c36, %c0_12] : memref<51x128xf32, #tpu.memory_space<vmem>>, vector<1x32xf32>
    %c37 = arith.constant 37 : index
    %c0_13 = arith.constant 0 : index
    %31 = vector.load %arg3[%c37, %c0_13] : memref<51x128xf32, #tpu.memory_space<vmem>>, vector<1x128xf32>
    %c38 = arith.constant 38 : index
    %c0_14 = arith.constant 0 : index
    %32 = vector.load %arg3[%c38, %c0_14] : memref<51x128xf32, #tpu.memory_space<vmem>>, vector<1x32xf32>
    %c39 = arith.constant 39 : index
    %c0_15 = arith.constant 0 : index
    %33 = vector.load %arg3[%c39, %c0_15] : memref<51x128xf32, #tpu.memory_space<vmem>>, vector<1x32xf32>
    %c40 = arith.constant 40 : index
    %c0_16 = arith.constant 0 : index
    %34 = vector.load %arg3[%c40, %c0_16] : memref<51x128xf32, #tpu.memory_space<vmem>>, vector<1x32xf32>
    %c41 = arith.constant 41 : index
    %c0_17 = arith.constant 0 : index
    %35 = vector.load %arg3[%c41, %c0_17] : memref<51x128xf32, #tpu.memory_space<vmem>>, vector<1x32xf32>
    %c42 = arith.constant 42 : index
    %c0_18 = arith.constant 0 : index
    %36 = vector.load %arg3[%c42, %c0_18] : memref<51x128xf32, #tpu.memory_space<vmem>>, vector<1x32xf32>
    %c0_19 = arith.constant 0 : index
    %c0_20 = arith.constant 0 : index
    %c0_21 = arith.constant 0 : index
    %37 = vector.load %arg4[%c0_19, %c0_20, %c0_21] : memref<2x32x96xf32, #tpu.memory_space<vmem>>, vector<1x32x96xf32>
    %38 = vector.shape_cast %37 : vector<1x32x96xf32> to vector<32x96xf32>
    %cst_22 = arith.constant dense<0.000000e+00> : vector<8x96xf32>
    %39 = tpu.matmul %25, %38, %cst_22 {dimension_numbers = #tpu.dot_dimension_numbers<[1], [0], [0], [1], [0, 0, 1, 1], [], []>} : vector<8x32xf32>, vector<32x96xf32>, vector<8x96xf32> -> vector<8x96xf32>
    %40 = vector.broadcast %29 : vector<1x96xf32> to vector<8x96xf32>
    %41 = arith.addf %39, %40 : vector<8x96xf32>
    %42 = vector.extract_strided_slice %41 {offsets = [0, 0], sizes = [8, 32], strides = [1, 1]} : vector<8x96xf32> to vector<8x32xf32>
    %43 = vector.shape_cast %42 : vector<8x32xf32> to vector<8x2x16xf32>
    %44 = vector.extract_strided_slice %41 {offsets = [0, 32], sizes = [8, 32], strides = [1, 1]} : vector<8x96xf32> to vector<8x32xf32>
    %45 = vector.shape_cast %44 : vector<8x32xf32> to vector<8x2x16xf32>
    %46 = vector.extract_strided_slice %41 {offsets = [0, 64], sizes = [8, 32], strides = [1, 1]} : vector<8x96xf32> to vector<8x32xf32>
    %47 = vector.shape_cast %46 : vector<8x32xf32> to vector<8x2x16xf32>
    "tpu.trace_start"() <{level = 10 : i32, message = "qhd,khd->hqk"}> : () -> ()
    %cst_23 = arith.constant dense<0.000000e+00> : vector<2x8x8xf32>
    %48 = tpu.matmul %43, %45, %cst_23 {dimension_numbers = #tpu.dot_dimension_numbers<[2], [2], [0], [0], [0, 1, 0, 0, 1, 0], [1], [1]>} : vector<8x2x16xf32>, vector<8x2x16xf32>, vector<2x8x8xf32> -> vector<2x8x8xf32>
    "tpu.trace_stop"() : () -> ()
    %cst_24 = arith.constant 2.500000e-01 : f32
    %49 = vector.broadcast %cst_24 : f32 to vector<2x8x8xf32>
    %50 = arith.mulf %48, %49 : vector<2x8x8xf32>
    %51 = vector.broadcast %28 : vector<1x1x8xf32> to vector<2x8x8xf32>
    %52 = arith.addf %50, %51 : vector<2x8x8xf32>
    %cst_25 = arith.constant dense<0xFF800000> : vector<2x8xf32>
    %53 = vector.multi_reduction <maximumf>, %52, %cst_25 [2] : vector<2x8x8xf32> to vector<2x8xf32>
    %54 = vector.shape_cast %53 : vector<2x8xf32> to vector<2x8x1xf32>
    %55 = vector.broadcast %54 : vector<2x8x1xf32> to vector<2x8x8xf32>
    %56 = arith.subf %52, %55 : vector<2x8x8xf32>
    %57 = math.exp %56 : vector<2x8x8xf32>
    %cst_26 = arith.constant dense<0.000000e+00> : vector<2x8xf32>
    %58 = vector.multi_reduction <add>, %57, %cst_26 [2] : vector<2x8x8xf32> to vector<2x8xf32>
    %59 = vector.shape_cast %58 : vector<2x8xf32> to vector<2x8x1xf32>
    %60 = vector.broadcast %59 : vector<2x8x1xf32> to vector<2x8x8xf32>
    %61 = arith.divf %57, %60 : vector<2x8x8xf32>
    "tpu.trace_start"() <{level = 10 : i32, message = "hqk,khd->qhd"}> : () -> ()
    %cst_27 = arith.constant dense<0.000000e+00> : vector<2x16x8xf32>
    %62 = tpu.matmul %47, %61, %cst_27 {dimension_numbers = #tpu.dot_dimension_numbers<[0], [2], [2], [1], [0, 1, 0, 2, 1, 1], [1], [0]>} : vector<8x2x16xf32>, vector<2x8x8xf32>, vector<2x16x8xf32> -> vector<2x16x8xf32>
    %63 = tpu.transpose %62, [2, 0, 1] : vector<2x16x8xf32> -> vector<8x2x16xf32>
    "tpu.trace_stop"() : () -> ()
    %64 = vector.shape_cast %63 : vector<8x2x16xf32> to vector<8x32xf32>
    %c0_28 = arith.constant 0 : index
    %c0_29 = arith.constant 0 : index
    %c0_30 = arith.constant 0 : index
    %65 = vector.load %arg5[%c0_28, %c0_29, %c0_30] : memref<2x32x32xf32, #tpu.memory_space<vmem>>, vector<1x32x32xf32>
    %66 = vector.shape_cast %65 : vector<1x32x32xf32> to vector<32x32xf32>
    %cst_31 = arith.constant dense<0.000000e+00> : vector<8x32xf32>
    %67 = tpu.matmul %64, %66, %cst_31 {dimension_numbers = #tpu.dot_dimension_numbers<[1], [0], [0], [1], [0, 0, 1, 1], [], []>} : vector<8x32xf32>, vector<32x32xf32>, vector<8x32xf32> -> vector<8x32xf32>
    %68 = vector.broadcast %30 : vector<1x32xf32> to vector<8x32xf32>
    %69 = arith.addf %67, %68 : vector<8x32xf32>
    %70 = arith.addf %25, %69 : vector<8x32xf32>
    %cst_32 = arith.constant dense<0.000000e+00> : vector<8xf32>
    %71 = vector.multi_reduction <add>, %70, %cst_32 [1] : vector<8x32xf32> to vector<8xf32>
    %72 = vector.shape_cast %71 : vector<8xf32> to vector<8x1xf32>
    %cst_33 = arith.constant 3.200000e+01 : f32
    %73 = vector.broadcast %cst_33 : f32 to vector<8x1xf32>
    %74 = arith.divf %72, %73 : vector<8x1xf32>
    %75 = vector.broadcast %74 : vector<8x1xf32> to vector<8x32xf32>
    %76 = arith.subf %70, %75 : vector<8x32xf32>
    %77 = arith.mulf %76, %76 : vector<8x32xf32>
    %cst_34 = arith.constant dense<0.000000e+00> : vector<8xf32>
    %78 = vector.multi_reduction <add>, %77, %cst_34 [1] : vector<8x32xf32> to vector<8xf32>
    %79 = vector.shape_cast %78 : vector<8xf32> to vector<8x1xf32>
    %cst_35 = arith.constant 3.200000e+01 : f32
    %80 = vector.broadcast %cst_35 : f32 to vector<8x1xf32>
    %81 = arith.divf %79, %80 : vector<8x1xf32>
    %82 = vector.broadcast %74 : vector<8x1xf32> to vector<8x32xf32>
    %83 = arith.subf %70, %82 : vector<8x32xf32>
    %cst_36 = arith.constant 9.99999996E-13 : f32
    %84 = vector.broadcast %cst_36 : f32 to vector<8x1xf32>
    %85 = arith.addf %81, %84 : vector<8x1xf32>
    %86 = math.rsqrt %85 : vector<8x1xf32>
    %87 = vector.broadcast %86 : vector<8x1xf32> to vector<8x32xf32>
    %88 = arith.mulf %83, %87 : vector<8x32xf32>
    %89 = vector.broadcast %33 : vector<1x32xf32> to vector<8x32xf32>
    %90 = arith.mulf %88, %89 : vector<8x32xf32>
    %91 = vector.broadcast %34 : vector<1x32xf32> to vector<8x32xf32>
    %92 = arith.addf %90, %91 : vector<8x32xf32>
    %c0_37 = arith.constant 0 : index
    %c0_38 = arith.constant 0 : index
    %c0_39 = arith.constant 0 : index
    %93 = vector.load %arg6[%c0_37, %c0_38, %c0_39] : memref<2x32x128xf32, #tpu.memory_space<vmem>>, vector<1x32x128xf32>
    %94 = vector.shape_cast %93 : vector<1x32x128xf32> to vector<32x128xf32>
    %cst_40 = arith.constant dense<0.000000e+00> : vector<8x128xf32>
    %95 = tpu.matmul %92, %94, %cst_40 {dimension_numbers = #tpu.dot_dimension_numbers<[1], [0], [0], [1], [0, 0, 1, 1], [], []>} : vector<8x32xf32>, vector<32x128xf32>, vector<8x128xf32> -> vector<8x128xf32>
    %96 = vector.broadcast %31 : vector<1x128xf32> to vector<8x128xf32>
    %97 = arith.addf %95, %96 : vector<8x128xf32>
    %98 = arith.mulf %97, %97 : vector<8x128xf32>
    %99 = arith.mulf %97, %98 : vector<8x128xf32>
    %cst_41 = arith.constant 4.471500e-02 : f32
    %100 = vector.broadcast %cst_41 : f32 to vector<8x128xf32>
    %101 = arith.mulf %100, %99 : vector<8x128xf32>
    %102 = arith.addf %97, %101 : vector<8x128xf32>
    %cst_42 = arith.constant 0.797884583 : f32
    %103 = vector.broadcast %cst_42 : f32 to vector<8x128xf32>
    %104 = arith.mulf %103, %102 : vector<8x128xf32>
    %105 = math.tanh %104 : vector<8x128xf32>
    %cst_43 = arith.constant 1.000000e+00 : f32
    %106 = vector.broadcast %cst_43 : f32 to vector<8x128xf32>
    %107 = arith.addf %106, %105 : vector<8x128xf32>
    %cst_44 = arith.constant 5.000000e-01 : f32
    %108 = vector.broadcast %cst_44 : f32 to vector<8x128xf32>
    %109 = arith.mulf %108, %107 : vector<8x128xf32>
    %110 = arith.mulf %97, %109 : vector<8x128xf32>
    %c0_45 = arith.constant 0 : index
    %c0_46 = arith.constant 0 : index
    %c0_47 = arith.constant 0 : index
    %111 = vector.load %arg7[%c0_45, %c0_46, %c0_47] : memref<2x128x32xf32, #tpu.memory_space<vmem>>, vector<1x128x32xf32>
    %112 = vector.shape_cast %111 : vector<1x128x32xf32> to vector<128x32xf32>
    %cst_48 = arith.constant dense<0.000000e+00> : vector<8x32xf32>
    %113 = tpu.matmul %110, %112, %cst_48 {dimension_numbers = #tpu.dot_dimension_numbers<[1], [0], [0], [1], [0, 0, 1, 1], [], []>} : vector<8x128xf32>, vector<128x32xf32>, vector<8x32xf32> -> vector<8x32xf32>
    %114 = vector.broadcast %32 : vector<1x32xf32> to vector<8x32xf32>
    %115 = arith.addf %113, %114 : vector<8x32xf32>
    %116 = arith.addf %92, %115 : vector<8x32xf32>
    %cst_49 = arith.constant dense<0.000000e+00> : vector<8xf32>
    %117 = vector.multi_reduction <add>, %116, %cst_49 [1] : vector<8x32xf32> to vector<8xf32>
    %118 = vector.shape_cast %117 : vector<8xf32> to vector<8x1xf32>
    %cst_50 = arith.constant 3.200000e+01 : f32
    %119 = vector.broadcast %cst_50 : f32 to vector<8x1xf32>
    %120 = arith.divf %118, %119 : vector<8x1xf32>
    %121 = vector.broadcast %120 : vector<8x1xf32> to vector<8x32xf32>
    %122 = arith.subf %116, %121 : vector<8x32xf32>
    %123 = arith.mulf %122, %122 : vector<8x32xf32>
    %cst_51 = arith.constant dense<0.000000e+00> : vector<8xf32>
    %124 = vector.multi_reduction <add>, %123, %cst_51 [1] : vector<8x32xf32> to vector<8xf32>
    %125 = vector.shape_cast %124 : vector<8xf32> to vector<8x1xf32>
    %cst_52 = arith.constant 3.200000e+01 : f32
    %126 = vector.broadcast %cst_52 : f32 to vector<8x1xf32>
    %127 = arith.divf %125, %126 : vector<8x1xf32>
    %128 = vector.broadcast %120 : vector<8x1xf32> to vector<8x32xf32>
    %129 = arith.subf %116, %128 : vector<8x32xf32>
    %cst_53 = arith.constant 9.99999996E-13 : f32
    %130 = vector.broadcast %cst_53 : f32 to vector<8x1xf32>
    %131 = arith.addf %127, %130 : vector<8x1xf32>
    %132 = math.rsqrt %131 : vector<8x1xf32>
    %133 = vector.broadcast %132 : vector<8x1xf32> to vector<8x32xf32>
    %134 = arith.mulf %129, %133 : vector<8x32xf32>
    %135 = vector.broadcast %35 : vector<1x32xf32> to vector<8x32xf32>
    %136 = arith.mulf %134, %135 : vector<8x32xf32>
    %137 = vector.broadcast %36 : vector<1x32xf32> to vector<8x32xf32>
    %138 = arith.addf %136, %137 : vector<8x32xf32>
    %c43 = arith.constant 43 : index
    %c0_54 = arith.constant 0 : index
    %139 = vector.load %arg3[%c43, %c0_54] : memref<51x128xf32, #tpu.memory_space<vmem>>, vector<1x96xf32>
    %c44 = arith.constant 44 : index
    %c0_55 = arith.constant 0 : index
    %140 = vector.load %arg3[%c44, %c0_55] : memref<51x128xf32, #tpu.memory_space<vmem>>, vector<1x32xf32>
    %c45 = arith.constant 45 : index
    %c0_56 = arith.constant 0 : index
    %141 = vector.load %arg3[%c45, %c0_56] : memref<51x128xf32, #tpu.memory_space<vmem>>, vector<1x128xf32>
    %c46 = arith.constant 46 : index
    %c0_57 = arith.constant 0 : index
    %142 = vector.load %arg3[%c46, %c0_57] : memref<51x128xf32, #tpu.memory_space<vmem>>, vector<1x32xf32>
    %c47 = arith.constant 47 : index
    %c0_58 = arith.constant 0 : index
    %143 = vector.load %arg3[%c47, %c0_58] : memref<51x128xf32, #tpu.memory_space<vmem>>, vector<1x32xf32>
    %c48 = arith.constant 48 : index
    %c0_59 = arith.constant 0 : index
    %144 = vector.load %arg3[%c48, %c0_59] : memref<51x128xf32, #tpu.memory_space<vmem>>, vector<1x32xf32>
    %c49 = arith.constant 49 : index
    %c0_60 = arith.constant 0 : index
    %145 = vector.load %arg3[%c49, %c0_60] : memref<51x128xf32, #tpu.memory_space<vmem>>, vector<1x32xf32>
    %c50 = arith.constant 50 : index
    %c0_61 = arith.constant 0 : index
    %146 = vector.load %arg3[%c50, %c0_61] : memref<51x128xf32, #tpu.memory_space<vmem>>, vector<1x32xf32>
    %c1 = arith.constant 1 : index
    %c0_62 = arith.constant 0 : index
    %c0_63 = arith.constant 0 : index
    %147 = vector.load %arg4[%c1, %c0_62, %c0_63] : memref<2x32x96xf32, #tpu.memory_space<vmem>>, vector<1x32x96xf32>
    %148 = vector.shape_cast %147 : vector<1x32x96xf32> to vector<32x96xf32>
    %cst_64 = arith.constant dense<0.000000e+00> : vector<8x96xf32>
    %149 = tpu.matmul %138, %148, %cst_64 {dimension_numbers = #tpu.dot_dimension_numbers<[1], [0], [0], [1], [0, 0, 1, 1], [], []>} : vector<8x32xf32>, vector<32x96xf32>, vector<8x96xf32> -> vector<8x96xf32>
    %150 = vector.broadcast %139 : vector<1x96xf32> to vector<8x96xf32>
    %151 = arith.addf %149, %150 : vector<8x96xf32>
    %152 = vector.extract_strided_slice %151 {offsets = [0, 0], sizes = [8, 32], strides = [1, 1]} : vector<8x96xf32> to vector<8x32xf32>
    %153 = vector.shape_cast %152 : vector<8x32xf32> to vector<8x2x16xf32>
    %154 = vector.extract_strided_slice %151 {offsets = [0, 32], sizes = [8, 32], strides = [1, 1]} : vector<8x96xf32> to vector<8x32xf32>
    %155 = vector.shape_cast %154 : vector<8x32xf32> to vector<8x2x16xf32>
    %156 = vector.extract_strided_slice %151 {offsets = [0, 64], sizes = [8, 32], strides = [1, 1]} : vector<8x96xf32> to vector<8x32xf32>
    %157 = vector.shape_cast %156 : vector<8x32xf32> to vector<8x2x16xf32>
    "tpu.trace_start"() <{level = 10 : i32, message = "qhd,khd->hqk"}> : () -> ()
    %cst_65 = arith.constant dense<0.000000e+00> : vector<2x8x8xf32>
    %158 = tpu.matmul %153, %155, %cst_65 {dimension_numbers = #tpu.dot_dimension_numbers<[2], [2], [0], [0], [0, 1, 0, 0, 1, 0], [1], [1]>} : vector<8x2x16xf32>, vector<8x2x16xf32>, vector<2x8x8xf32> -> vector<2x8x8xf32>
    "tpu.trace_stop"() : () -> ()
    %cst_66 = arith.constant 2.500000e-01 : f32
    %159 = vector.broadcast %cst_66 : f32 to vector<2x8x8xf32>
    %160 = arith.mulf %158, %159 : vector<2x8x8xf32>
    %161 = vector.broadcast %28 : vector<1x1x8xf32> to vector<2x8x8xf32>
    %162 = arith.addf %160, %161 : vector<2x8x8xf32>
    %cst_67 = arith.constant dense<0xFF800000> : vector<2x8xf32>
    %163 = vector.multi_reduction <maximumf>, %162, %cst_67 [2] : vector<2x8x8xf32> to vector<2x8xf32>
    %164 = vector.shape_cast %163 : vector<2x8xf32> to vector<2x8x1xf32>
    %165 = vector.broadcast %164 : vector<2x8x1xf32> to vector<2x8x8xf32>
    %166 = arith.subf %162, %165 : vector<2x8x8xf32>
    %167 = math.exp %166 : vector<2x8x8xf32>
    %cst_68 = arith.constant dense<0.000000e+00> : vector<2x8xf32>
    %168 = vector.multi_reduction <add>, %167, %cst_68 [2] : vector<2x8x8xf32> to vector<2x8xf32>
    %169 = vector.shape_cast %168 : vector<2x8xf32> to vector<2x8x1xf32>
    %170 = vector.broadcast %169 : vector<2x8x1xf32> to vector<2x8x8xf32>
    %171 = arith.divf %167, %170 : vector<2x8x8xf32>
    "tpu.trace_start"() <{level = 10 : i32, message = "hqk,khd->qhd"}> : () -> ()
    %cst_69 = arith.constant dense<0.000000e+00> : vector<2x16x8xf32>
    %172 = tpu.matmul %157, %171, %cst_69 {dimension_numbers = #tpu.dot_dimension_numbers<[0], [2], [2], [1], [0, 1, 0, 2, 1, 1], [1], [0]>} : vector<8x2x16xf32>, vector<2x8x8xf32>, vector<2x16x8xf32> -> vector<2x16x8xf32>
    %173 = tpu.transpose %172, [2, 0, 1] : vector<2x16x8xf32> -> vector<8x2x16xf32>
    "tpu.trace_stop"() : () -> ()
    %174 = vector.shape_cast %173 : vector<8x2x16xf32> to vector<8x32xf32>
    %c1_70 = arith.constant 1 : index
    %c0_71 = arith.constant 0 : index
    %c0_72 = arith.constant 0 : index
    %175 = vector.load %arg5[%c1_70, %c0_71, %c0_72] : memref<2x32x32xf32, #tpu.memory_space<vmem>>, vector<1x32x32xf32>
    %176 = vector.shape_cast %175 : vector<1x32x32xf32> to vector<32x32xf32>
    %cst_73 = arith.constant dense<0.000000e+00> : vector<8x32xf32>
    %177 = tpu.matmul %174, %176, %cst_73 {dimension_numbers = #tpu.dot_dimension_numbers<[1], [0], [0], [1], [0, 0, 1, 1], [], []>} : vector<8x32xf32>, vector<32x32xf32>, vector<8x32xf32> -> vector<8x32xf32>
    %178 = vector.broadcast %140 : vector<1x32xf32> to vector<8x32xf32>
    %179 = arith.addf %177, %178 : vector<8x32xf32>
    %180 = arith.addf %138, %179 : vector<8x32xf32>
    %cst_74 = arith.constant dense<0.000000e+00> : vector<8xf32>
    %181 = vector.multi_reduction <add>, %180, %cst_74 [1] : vector<8x32xf32> to vector<8xf32>
    %182 = vector.shape_cast %181 : vector<8xf32> to vector<8x1xf32>
    %cst_75 = arith.constant 3.200000e+01 : f32
    %183 = vector.broadcast %cst_75 : f32 to vector<8x1xf32>
    %184 = arith.divf %182, %183 : vector<8x1xf32>
    %185 = vector.broadcast %184 : vector<8x1xf32> to vector<8x32xf32>
    %186 = arith.subf %180, %185 : vector<8x32xf32>
    %187 = arith.mulf %186, %186 : vector<8x32xf32>
    %cst_76 = arith.constant dense<0.000000e+00> : vector<8xf32>
    %188 = vector.multi_reduction <add>, %187, %cst_76 [1] : vector<8x32xf32> to vector<8xf32>
    %189 = vector.shape_cast %188 : vector<8xf32> to vector<8x1xf32>
    %cst_77 = arith.constant 3.200000e+01 : f32
    %190 = vector.broadcast %cst_77 : f32 to vector<8x1xf32>
    %191 = arith.divf %189, %190 : vector<8x1xf32>
    %192 = vector.broadcast %184 : vector<8x1xf32> to vector<8x32xf32>
    %193 = arith.subf %180, %192 : vector<8x32xf32>
    %cst_78 = arith.constant 9.99999996E-13 : f32
    %194 = vector.broadcast %cst_78 : f32 to vector<8x1xf32>
    %195 = arith.addf %191, %194 : vector<8x1xf32>
    %196 = math.rsqrt %195 : vector<8x1xf32>
    %197 = vector.broadcast %196 : vector<8x1xf32> to vector<8x32xf32>
    %198 = arith.mulf %193, %197 : vector<8x32xf32>
    %199 = vector.broadcast %143 : vector<1x32xf32> to vector<8x32xf32>
    %200 = arith.mulf %198, %199 : vector<8x32xf32>
    %201 = vector.broadcast %144 : vector<1x32xf32> to vector<8x32xf32>
    %202 = arith.addf %200, %201 : vector<8x32xf32>
    %c1_79 = arith.constant 1 : index
    %c0_80 = arith.constant 0 : index
    %c0_81 = arith.constant 0 : index
    %203 = vector.load %arg6[%c1_79, %c0_80, %c0_81] : memref<2x32x128xf32, #tpu.memory_space<vmem>>, vector<1x32x128xf32>
    %204 = vector.shape_cast %203 : vector<1x32x128xf32> to vector<32x128xf32>
    %cst_82 = arith.constant dense<0.000000e+00> : vector<8x128xf32>
    %205 = tpu.matmul %202, %204, %cst_82 {dimension_numbers = #tpu.dot_dimension_numbers<[1], [0], [0], [1], [0, 0, 1, 1], [], []>} : vector<8x32xf32>, vector<32x128xf32>, vector<8x128xf32> -> vector<8x128xf32>
    %206 = vector.broadcast %141 : vector<1x128xf32> to vector<8x128xf32>
    %207 = arith.addf %205, %206 : vector<8x128xf32>
    %208 = arith.mulf %207, %207 : vector<8x128xf32>
    %209 = arith.mulf %207, %208 : vector<8x128xf32>
    %cst_83 = arith.constant 4.471500e-02 : f32
    %210 = vector.broadcast %cst_83 : f32 to vector<8x128xf32>
    %211 = arith.mulf %210, %209 : vector<8x128xf32>
    %212 = arith.addf %207, %211 : vector<8x128xf32>
    %cst_84 = arith.constant 0.797884583 : f32
    %213 = vector.broadcast %cst_84 : f32 to vector<8x128xf32>
    %214 = arith.mulf %213, %212 : vector<8x128xf32>
    %215 = math.tanh %214 : vector<8x128xf32>
    %cst_85 = arith.constant 1.000000e+00 : f32
    %216 = vector.broadcast %cst_85 : f32 to vector<8x128xf32>
    %217 = arith.addf %216, %215 : vector<8x128xf32>
    %cst_86 = arith.constant 5.000000e-01 : f32
    %218 = vector.broadcast %cst_86 : f32 to vector<8x128xf32>
    %219 = arith.mulf %218, %217 : vector<8x128xf32>
    %220 = arith.mulf %207, %219 : vector<8x128xf32>
    %c1_87 = arith.constant 1 : index
    %c0_88 = arith.constant 0 : index
    %c0_89 = arith.constant 0 : index
    %221 = vector.load %arg7[%c1_87, %c0_88, %c0_89] : memref<2x128x32xf32, #tpu.memory_space<vmem>>, vector<1x128x32xf32>
    %222 = vector.shape_cast %221 : vector<1x128x32xf32> to vector<128x32xf32>
    %cst_90 = arith.constant dense<0.000000e+00> : vector<8x32xf32>
    %223 = tpu.matmul %220, %222, %cst_90 {dimension_numbers = #tpu.dot_dimension_numbers<[1], [0], [0], [1], [0, 0, 1, 1], [], []>} : vector<8x128xf32>, vector<128x32xf32>, vector<8x32xf32> -> vector<8x32xf32>
    %224 = vector.broadcast %142 : vector<1x32xf32> to vector<8x32xf32>
    %225 = arith.addf %223, %224 : vector<8x32xf32>
    %226 = arith.addf %202, %225 : vector<8x32xf32>
    %cst_91 = arith.constant dense<0.000000e+00> : vector<8xf32>
    %227 = vector.multi_reduction <add>, %226, %cst_91 [1] : vector<8x32xf32> to vector<8xf32>
    %228 = vector.shape_cast %227 : vector<8xf32> to vector<8x1xf32>
    %cst_92 = arith.constant 3.200000e+01 : f32
    %229 = vector.broadcast %cst_92 : f32 to vector<8x1xf32>
    %230 = arith.divf %228, %229 : vector<8x1xf32>
    %231 = vector.broadcast %230 : vector<8x1xf32> to vector<8x32xf32>
    %232 = arith.subf %226, %231 : vector<8x32xf32>
    %233 = arith.mulf %232, %232 : vector<8x32xf32>
    %cst_93 = arith.constant dense<0.000000e+00> : vector<8xf32>
    %234 = vector.multi_reduction <add>, %233, %cst_93 [1] : vector<8x32xf32> to vector<8xf32>
    %235 = vector.shape_cast %234 : vector<8xf32> to vector<8x1xf32>
    %cst_94 = arith.constant 3.200000e+01 : f32
    %236 = vector.broadcast %cst_94 : f32 to vector<8x1xf32>
    %237 = arith.divf %235, %236 : vector<8x1xf32>
    %238 = vector.broadcast %230 : vector<8x1xf32> to vector<8x32xf32>
    %239 = arith.subf %226, %238 : vector<8x32xf32>
    %cst_95 = arith.constant 9.99999996E-13 : f32
    %240 = vector.broadcast %cst_95 : f32 to vector<8x1xf32>
    %241 = arith.addf %237, %240 : vector<8x1xf32>
    %242 = math.rsqrt %241 : vector<8x1xf32>
    %243 = vector.broadcast %242 : vector<8x1xf32> to vector<8x32xf32>
    %244 = arith.mulf %239, %243 : vector<8x32xf32>
    %245 = vector.broadcast %145 : vector<1x32xf32> to vector<8x32xf32>
    %246 = arith.mulf %244, %245 : vector<8x32xf32>
    %247 = vector.broadcast %146 : vector<1x32xf32> to vector<8x32xf32>
    %248 = arith.addf %246, %247 : vector<8x32xf32>
    %c0_96 = arith.constant 0 : index
    %c0_97 = arith.constant 0 : index
    %249 = vector.load %arg3[%c0_96, %c0_97] : memref<51x128xf32, #tpu.memory_space<vmem>>, vector<32x128xf32>
    %c32 = arith.constant 32 : index
    %c0_98 = arith.constant 0 : index
    %250 = vector.load %arg3[%c32, %c0_98] : memref<51x128xf32, #tpu.memory_space<vmem>>, vector<1x128xf32>
    %cst_99 = arith.constant dense<0.000000e+00> : vector<8x128xf32>
    %251 = tpu.matmul %248, %249, %cst_99 {dimension_numbers = #tpu.dot_dimension_numbers<[1], [0], [0], [1], [0, 0, 1, 1], [], []>} : vector<8x32xf32>, vector<32x128xf32>, vector<8x128xf32> -> vector<8x128xf32>
    %252 = vector.broadcast %250 : vector<1x128xf32> to vector<8x128xf32>
    %253 = arith.addf %251, %252 : vector<8x128xf32>
    %c0_100 = arith.constant 0 : index
    %c0_101 = arith.constant 0 : index
    %c0_102 = arith.constant 0 : index
    %254 = vector.load %arg8[%c0_100, %c0_101, %c0_102] : memref<1x8x128xf32, #tpu.memory_space<vmem>>, vector<1x8x128xf32>
    %255 = vector.shape_cast %254 : vector<1x8x128xf32> to vector<8x128xf32>
    %256 = vector.shape_cast %253 : vector<8x128xf32> to vector<1x8x128xf32>
    tpu.vector_store %arg8[%c0_100, %c0_101, %c0_102], %256 {strides = array<i32>} : memref<1x8x128xf32, #tpu.memory_space<vmem>>, vector<1x8x128xf32>,
    return
  }
  func.func @transform_0(%arg0: i32) -> (i32, i32, i32) {
    %c0_i32 = arith.constant 0 : i32
    %c0_i32_0 = arith.constant 0 : i32
    %c0_i32_1 = arith.constant 0 : i32
    return %arg0, %c0_i32, %c0_i32_0 : i32, i32, i32
  }
  func.func @transform_1(%arg0: i32) -> (i32, i32, i32) {
    %c0_i32 = arith.constant 0 : i32
    %c0_i32_0 = arith.constant 0 : i32
    %c0_i32_1 = arith.constant 0 : i32
    return %arg0, %c0_i32, %c0_i32_0 : i32, i32, i32
  }
  func.func @transform_2(%arg0: i32) -> (i32, i32) {
    %c0_i32 = arith.constant 0 : i32
    %c0_i32_0 = arith.constant 0 : i32
    %c0_i32_1 = arith.constant 0 : i32
    return %c0_i32, %c0_i32_0 : i32, i32
  }
  func.func @transform_3(%arg0: i32) -> (i32, i32, i32) {
    %c0_i32 = arith.constant 0 : i32
    %c0_i32_0 = arith.constant 0 : i32
    %c0_i32_1 = arith.constant 0 : i32
    %c0_i32_2 = arith.constant 0 : i32
    return %c0_i32, %c0_i32_0, %c0_i32_1 : i32, i32, i32
  }
  func.func @transform_4(%arg0: i32) -> (i32, i32, i32) {
    %c0_i32 = arith.constant 0 : i32
    %c0_i32_0 = arith.constant 0 : i32
    %c0_i32_1 = arith.constant 0 : i32
    %c0_i32_2 = arith.constant 0 : i32
    return %c0_i32, %c0_i32_0, %c0_i32_1 : i32, i32, i32
  }
  func.func @transform_5(%arg0: i32) -> (i32, i32, i32) {
    %c0_i32 = arith.constant 0 : i32
    %c0_i32_0 = arith.constant 0 : i32
    %c0_i32_1 = arith.constant 0 : i32
    %c0_i32_2 = arith.constant 0 : i32
    return %c0_i32, %c0_i32_0, %c0_i32_1 : i32, i32, i32
  }
  func.func @transform_6(%arg0: i32) -> (i32, i32, i32) {
    %c0_i32 = arith.constant 0 : i32
    %c0_i32_0 = arith.constant 0 : i32
    %c0_i32_1 = arith.constant 0 : i32
    %c0_i32_2 = arith.constant 0 : i32
    return %c0_i32, %c0_i32_0, %c0_i32_1 : i32, i32, i32
  }
  func.func @transform_7(%arg0: i32) -> (i32, i32, i32) {
    %c0_i32 = arith.constant 0 : i32
    %c0_i32_0 = arith.constant 0 : i32
    %c0_i32_1 = arith.constant 0 : i32
    return %arg0, %c0_i32, %c0_i32_0 : i32, i32, i32
  }
}

</mosaic_0001>

<bundles_post_ra>
// kernel: bert_model_forward.1
= control target key start
LH: loop header
LB: loop body
LE: loop exit
PB: predicated region body
PF: predicated region fallthrough
CT: control target
= control target key end

     0   :  { %s3180_s24 = smov 0   ;;  %s3614_s0 = inlined_call_operand.vmem [shape: f32[2,8,32], index: 0, kind: input, shape index: {}]   ;;  %s3615_s1 = inlined_call_operand.vmem [shape: f32[2,1,8], index: 1, kind: input, shape index: {}]   ;;  %s3616_s2 = inlined_call_operand.vmem [shape: f32[51,128], index: 2, kind: input, shape index: {}]   ;;  %s3617_s3 = inlined_call_operand.vmem [shape: f32[2,32,96], index: 3, kind: input, shape index: {}]   ;;  %s3618_s4 = inlined_call_operand.vmem [shape: f32[2,32,32], index: 4, kind: input, shape index: {}]   ;;  %s3619_s5 = inlined_call_operand.vmem [shape: f32[2,32,128], index: 5, kind: input, shape index: {}]   ;;  %s3620_s6 = inlined_call_operand.vmem [shape: f32[2,128,32], index: 6, kind: input, shape index: {}]   ;;  %s3621_s7 = inlined_call_operand.vmem [shape: f32[2,8,128], index: 7, kind: output, shape index: {}]  }
   0x1 LB: > { %s2602_s25 = sadd.s32 4294967295, %s3129_s24   ;;  %p2606_p0 = scmp.ge.s32.totalorder %s3129_s24, 1  ;;  %s3129_s24 = sphi %s3180_s24, %s17_s24  }
   0x2   : > { %p244_p1 = scmp.lt.s32.totalorder %s3129_s24, 3 }
   0x4   : > { %p245_p2 = pnand %p2606_p0, %p244_p1 }
   0x5   : > { %p277_p3 = scmp.lt.s32.totalorder (!%p245_p2), %s2602_s25, 1  ;;  %vm291_vm0 = vcmask (!%p245_p2), 261120   ;;  %v325_v7 = vld [vmem:[%s3617_s3] sm:$0xff] (!%p245_p2)  ;;  %v326_v8 = vld [vmem:[%s3617_s3 + $0x8] sm:$0xff] (!%p245_p2)  ;;  %v327_v9 = vld [vmem:[%s3617_s3 + $0x10] sm:$0xff] (!%p245_p2)  ;;  %v3131_v10 = vmov (!%p245_p2), 0.0|0.0  }
   0x6   : > { %248 = sbr.rel (%p245_p2) target bundleno = 6365 (0x18dd), region = 48  ;;  %2974 = vmatprep.subr.bf16.mxu0 (!%p245_p2), %v3131_v10  ;;  %v2975_v11 = vpack.c.bf16 (!%p245_p2), %v326_v8, %v325_v7  ;;  %v328_v12 = vld [vmem:[%s3617_s3 + $0x18] sm:$0xff] (!%p245_p2)  ;;  %vm3132_vm1 = vmmov (!%p245_p2), 0   ;;  %v3133_v13 = vmov (!%p245_p2), 0.0   ;;  %2980 = vmatprep.subr.bf16.mxu1 (!%p245_p2), %v3131_v10  ;;  %v2609_v19 = vld [vmem:[%s3616_s2 + $0x21] ss:$0 sm:$0xff] (!%p245_p2) }
   0x7   : > { %2787 = vmatprep.mubr.msk.f32.mxu0 (!%p245_p2), %vm3132_vm1, %v3133_v13  ;;  %2794 = vmatprep.mubr.msk.f32.mxu1 (!%p245_p2), %vm3132_vm1, %v3133_v13  ;;  %v2978_v14 = vpack.c.bf16 (!%p245_p2), %v328_v12, %v327_v9  ;;  %v2610_v21 = vld [vmem:[%s3616_s2 + $0x22] ss:$0 sm:$0xff] (!%p245_p2)  ;;  %v2611_v24 = vld [vmem:[%s3616_s2 + $0x23] ss:$0 sm:$0xff] (!%p245_p2)  ;;  %s3134_s21 = smov (!%p245_p2), 112   ;;  %s3135_s22 = smov (!%p245_p2), 96  }
   0x8   : > { %2976 = vmatpush3.bf16.msra.mxu0 (!%p245_p2), %v2975_v11  ;;  %vm479_vm2 = vcmask (!%p245_p2), 130048   ;;  %vm634_vm3 = vcmask (!%p245_p2), 64512   ;;  %v1080_v11 = vld [vmem:[%s3618_s4] sm:$0xff] (!%p245_p2)  ;;  %v1081_v12 = vld [vmem:[%s3618_s4 + $0x8] sm:$0xff] (!%p245_p2)  ;;  %s3139_s15 = smov (!%p245_p2), 16  }
   0x9   : > { %2977 = vmatprep.subr.bf16.mxu0 (!%p245_p2), %v3131_v10 }
   0xc   : > { %2979 = vmatpush3.bf16.msra.mxu0 (!%p245_p2), %v2978_v14  ;;  %v1082_v14 = vld [vmem:[%s3618_s4 + $0x10] sm:$0xff] (!%p245_p2) }
   0xd   : > { %s3623_s25 = smov (!%p277_p3, %s2602_s25), 1 }
   0xe   : > { %s2607_s26 = sshll.u32 %s3623_s25, 3  ;;  %s283_s28 = scalar_lea.vmem %s3615_s1, %s3623_s25 }
   0xf   : > { %s280_s29 = scalar_lea.vmem %s3614_s0, %s2607_s26  ;;  %v3242_v37 = vld [vmem:[%s283_s28] ss:$0 sm:$0xff]  ;;  %s287_s9 = scalar_lea.vmem %s3621_s7, %s2607_s26 }
  0x10   : > { %v290_v0 = vld [vmem:[%s280_s29] sm:$0xff]  ;;  %s3136_s29 = smov 64  }
  0x11   : > { %v292_v1 = vsel %vm291_vm0, %v290_v0, 0.0 }
  0x12   : > { %293 = vadd.xlane.f32.xlu0 %v292_v1 }
  0x9f   : > { %v294_v2 = vpop.xlane.xlu0 %293 }
  0xa0   : > { %v296_v3 = vmul.f32 0.03125, %v294_v2 }
  0xa2   : > { %v297_v4 = vsub.f32 %v290_v0, %v296_v3 }
  0xa4   : > { %v298_v5 = vmul.f32 %v297_v4, %v297_v4 }
  0xa6   : > { %v299_v6 = vsel %vm291_vm0, %v298_v5, 0.0 }
  0xa7   : > { %300 = vadd.xlane.f32.xlu0 %v299_v6 }
 0x134   : > { %v301_v15 = vpop.xlane.xlu0 %300 }
 0x135   : > { %v302_v16 = vmul.f32 0.03125, %v301_v15  ;;  %v2987_v15 = vpack.c.bf16 %v1081_v12, %v1080_v11  ;;  %v1186_v11 = vld [vmem:[%s3619_s5 + $0x8] sm:$0xff] }
 0x137   : > { %v303_v17 = vadd.f32 1e-12, %v302_v16  ;;  %v1083_v16 = vld [vmem:[%s3618_s4 + $0x18] sm:$0xff] }
 0x139   : > { %3093 = vrsqrt.f32 %v303_v17  ;;  %v2990_v17 = vpack.c.bf16 %v1083_v16, %v1082_v14  ;;  %v1188_v14 = vld [vmem:[%s3619_s5 + $0x18] sm:$0xff] }
 0x143   : > { %v3094_v18 = vpop.eup %3093 }
 0x144   : > { %v305_v20 = vmul.f32 %v3094_v18, %v297_v4  ;;  %v3137_v18 = vmov 1983009808  }
 0x146   : > { %v310_v22 = vmul.f32 %v2609_v19, %v305_v20  ;;  %v961_v19 = vunpack.c.l.s4 %v3137_v18  ;;  %v963_v20 = vlaneseq }
 0x148   : > { %v3223_v23 = vadd.f32 %v2610_v21, %v310_v22  ;;  %v962_v21 = vunpack.c.0.s8 %v961_v19  ;;  %v964_v22 = vshrl.u32 %v963_v20, 7  ;;  %v2626_v20 = vld [vmem:[%s3616_s2 + $0x27] ss:$0 sm:$0xff] }
 0x14a   : > { %2788 = vmatmul.mubr.msk.f32.vlgmr.msra.gmra.mrb[0].mxu0 %vm291_vm0, %v3223_v23 }
 0x21d   : > { %v402_v25 = vpop.f32.mrb[0].mxu0 }
 0x21e   : > { %v403_v26 = vadd.f32 %v2611_v24, %v402_v25  ;;  %v2789_v27 = vpop.f32.mrb[1].mxu0  ;;  %v3138_v24 = vmov 1934713408  }
 0x21f   : > { %v992_v25 = vunpack.c.l.s4 %v3138_v24  ;;  %v3280_v27 = vsub.s32 %v962_v21, %v964_v22  ;;  %v1276_v24 = vld [vmem:[%s3620_s6 + $0x8] sm:$0xff] }
 0x220   : > { %407 = vrot.lane.b32.xlu1 %v403_v26, %s3134_s21 }
 0x224   : > { %409 = vrot.lane.b32.xlu1 %v403_v26, %s3135_s22 }
 0x292   : > { %v408_v28 = vpop.permute.xlu1 %407 }
 0x293   : > { %411 = vrot.lane.b32.xlu0 %v408_v28, %s3135_s22 }
 0x296   : > { %v410_v29 = vpop.permute.xlu1 %409 }
 0x297   : > { %415 = vxpose.xlu1.b32.start.end [1/1] (short) (narrow) %v410_v29, 16 }
 0x305   : > { %v412_v30 = vpop.permute.xlu0 %411 }
 0x306   : > { %447 = vxpose.xlu0.b32.start.end [1/1] (short) (narrow) %v412_v30, 16 }
 0x317   : > { %v431_v31 = vpop.trf.xlu1 }
 0x31b   : > { %v432_v32 = vpop.trf.xlu1 }
 0x31c   : > { %v2981_v33 = vpack.c.bf16 %v432_v32, %v431_v31 }
 0x31e   : > { %2982 = vmatpush3.bf16.msra.mxu1 %v2981_v33 }
 0x31f   : > { %2983 = vmatprep.subr.bf16.mxu1 %v3131_v10 }
 0x321   : > { %2795 = vmatmul.mubr.msk.f32.vlgmr.msra.gmra.mrb[0].mxu1 %vm479_vm2, %v403_v26 }
 0x322   : > { %2801 = vmatprep.mubr.msk.f32.mxu1 %vm3132_vm1, %v3133_v13 }
 0x386   : > { %v463_v34 = vpop.trf.xlu0 }
 0x38a   : > { %v464_v35 = vpop.trf.xlu0 }
 0x38b   : > { %v2984_v36 = vpack.c.bf16 %v464_v35, %v463_v34 }
 0x38d   : > { %2985 = vmatpush3.bf16.msra.mxu1 %v2984_v36 }
 0x390   : > { %2802 = vmatmul.mubr.msk.f32.vlgmr.msra.gmra.mrb[2].mxu1 %vm479_vm2, %v408_v28 }
 0x3f4   : > { %v548_v38 = vpop.f32.mrb[0].mxu1 }
 0x3f5   : > { %v624_v39 = vmul.f32 0.25, %v548_v38  ;;  %v2796_v40 = vpop.f32.mrb[1].mxu1 }
 0x3f7   : > { %v632_v41 = vadd.f32 %v3242_v37, %v624_v39 }
 0x3f9   : > { %v635_v42 = vsel %vm634_vm3, %v632_v41, -inf }
 0x3fa   : > { %636 = vmax.xlane.f32.xlu1 %v635_v42 }
 0x40b   : > { %657 = vrot.lane.b32.xlu1 %v403_v26, %s3136_s29 }
 0x463   : > { %v620_v43 = vpop.f32.mrb[2].mxu1 }
 0x464   : > { %v625_v44 = vmul.f32 0.25, %v620_v43  ;;  %v2803_v45 = vpop.f32.mrb[3].mxu1 }
 0x466   : > { %v633_v46 = vadd.f32 %v3242_v37, %v625_v44 }
 0x468   : > { %v638_v47 = vsel %vm634_vm3, %v633_v46, -inf }
 0x469   : > { %639 = vmax.xlane.f32.xlu0 %v638_v47 }
 0x47f   : > { %659 = vrot.lane.b32.xlu0 %v408_v28, %s3136_s29  ;;  %v993_v28 = vunpack.c.0.s8 %v992_v25  ;;  %v2627_v25 = vld [vmem:[%s3616_s2 + $0x28] ss:$0 sm:$0xff] }
 0x481   : > { %v3284_v32 = vsub.s32 %v993_v28, %v964_v22  ;;  %v1275_v22 = vld [vmem:[%s3620_s6] sm:$0xff] }
 0x482   : > { %v2999_v28 = vpack.c.bf16 %v1276_v24, %v1275_v22 }
 0x487   : > { %v637_v48 = vpop.xlane.xlu1 %636 }
 0x488   : > { %v641_v49 = vsub.f32 %v632_v41, %v637_v48 }
 0x48a   : > { %v643_v50 = vmul.f32 1.442695, %v641_v49 }
 0x48b   : > { %v658_v53 = vpop.permute.xlu1 %657 }
 0x48c   : > { %3095 = vpow2.f32 %v643_v50 }
 0x496   : > { %v3096_v51 = vpop.eup %3095 }
 0x497   : > { %v647_v52 = vsel %vm634_vm3, %v3096_v51, 0.0 }
 0x498   : > { %648 = vadd.xlane.f32.xlu1 %v647_v52 }
 0x4cb   : > { %663 = vxpose.xlu1.b32.start.end [1/1] (short) (narrow) %v658_v53, 16 }
 0x4f6   : > { %v640_v54 = vpop.xlane.xlu0 %639 }
 0x4f7   : > { %v642_v55 = vsub.f32 %v633_v46, %v640_v54 }
 0x4f9   : > { %v645_v56 = vmul.f32 1.442695, %v642_v55 }
 0x4fa   : > { %v660_v62 = vpop.permute.xlu0 %659 }
 0x4fb   : > { %3097 = vpow2.f32 %v645_v56 }
 0x505   : > { %v3098_v57 = vpop.eup %3097 }
 0x506   : > { %v650_v58 = vsel %vm634_vm3, %v3098_v57, 0.0 }
 0x507   : > { %651 = vadd.xlane.f32.xlu0 %v650_v58 }
 0x525   : > { %v649_v59 = vpop.xlane.xlu1 %648 }
 0x526   : > { %3099 = vrcp.f32 %v649_v59 }
 0x530   : > { %v3100_v60 = vpop.eup %3099 }
 0x531   : > { %v654_v61 = vmul.f32 %v3100_v60, %v3096_v51 }
 0x533   : > { %2804 = vmatprep.subr.msk.mxu0 %vm634_vm3, %v654_v61 }
 0x534   : > { %2805 = vmatpush3.xpose.msk.msra.mxu0 %vm634_vm3, %v654_v61  ;;  %695 = vxpose.xlu0.b32.start.end [1/1] (short) (narrow) %v660_v62, 16  ;;  %v2624_v62 = vld [vmem:[%s3616_s2 + $0x24] ss:$0 sm:$0xff] }
 0x535   : > { %2986 = vmatprep.subr.bf16.mxu0 %v3131_v10 }
 0x54b   : > { %v679_v63 = vpop.trf.xlu1 }
 0x54c   : > { %2806 = vmatprep.mubr.msk.f32.mxu0 %vm634_vm3, %v679_v63 }
 0x54f   : > { %v680_v0 = vpop.trf.xlu1 }
 0x550   : > { %2807 = vmatmul.mubr.msk.f32.vlgmr.msra.gmra.mrb[2].mxu0 %vm634_vm3, %v680_v0 }
 0x551   : > { %2822 = vmatprep.mubr.msk.f32.mxu0 %vm3132_vm1, %v3133_v13  ;;  %2988 = vmatpush3.bf16.msra.mxu0 %v2987_v15 }
 0x552   : > { %2989 = vmatprep.subr.bf16.mxu0 %v3131_v10 }
 0x555   : > { %2991 = vmatpush3.bf16.msra.mxu0 %v2990_v17 }
 0x556   : > { %2992 = vmatprep.subr.bf16.mxu0 %v3131_v10 }
 0x594   : > { %v652_v1 = vpop.xlane.xlu0 %651 }
 0x595   : > { %3101 = vrcp.f32 %v652_v1 }
 0x59f   : > { %v3102_v2 = vpop.eup %3101 }
 0x5a0   : > { %v656_v3 = vmul.f32 %v3102_v2, %v3098_v57 }
 0x5a2   : > { %2809 = vmatprep.subr.msk.mxu1 %vm634_vm3, %v656_v3 }
 0x5a3   : > { %2810 = vmatpush3.xpose.msk.msra.mxu1 %vm634_vm3, %v656_v3 }
 0x5a4   : > { %3022 = vmatprep.subr.bf16.mxu1 %v3131_v10 }
 0x5b4   : > { %v711_v4 = vpop.trf.xlu0 }
 0x5b5   : > { %2811 = vmatprep.mubr.msk.f32.mxu1 %vm634_vm3, %v711_v4 }
 0x5b8   : > { %v712_v5 = vpop.trf.xlu0 }
 0x5b9   : > { %2812 = vmatmul.mubr.msk.f32.vlgmr.msra.gmra.mrb[4].mxu1 %vm634_vm3, %v712_v5 }
 0x5ba   : > { %2879 = vmatprep.mubr.msk.f32.mxu1 %vm3132_vm1, %v3133_v13 }
 0x623   : > { %v2808_v6 = vpop.f32.mrb[2].mxu0 }
 0x624   : > { %v802_v7 = vpop.f32.mrb[3].mxu0 }
 0x625   : > { %895 = vxpose.xlu1.b32.start [1/2] (short) (narrow) %v802_v7, 8 }
 0x629   : > { %896 = vxpose.xlu1.b32.end [2/2] (short) (narrow) %v2808_v6, 8 }
 0x68c   : > { %v2813_v8 = vpop.f32.mrb[4].mxu1 }
 0x68d   : > { %v886_v9 = vpop.f32.mrb[5].mxu1 }
 0x68e   : > { %927 = vxpose.xlu1.b32.start [1/2] (short) (narrow) %v886_v9, 8  ;;  %v1185_v9 = vld [vmem:[%s3619_s5] sm:$0xff] }
 0x68f   : > { %v2993_v12 = vpack.c.bf16 %v1186_v11, %v1185_v9 }
 0x692   : > { %928 = vxpose.xlu1.b32.end [2/2] (short) (narrow) %v2813_v8, 8 }
 0x6a5   : > { %v911_v26 = vpop.trf.xlu1 }
 0x6a6   : > { %v959_v29 = vcombine.high %v911_v26, %v3133_v13  ;;  %v966_v31 = vrot.slane %v911_v26, %v3280_v27 }
 0x6a8   : > { %v973_v35 = vrot.slane %v959_v29, %v3280_v27 }
 0x70e   : > { %v943_v30 = vpop.trf.xlu1 }
 0x70f   : > { %v974_v33 = vcombine.high %v943_v30, %v3133_v13  ;;  %v981_v34 = vrot.slane %v943_v30, %v3280_v27  ;;  %v1277_v30 = vld [vmem:[%s3620_s6 + $0x10] sm:$0xff] }
 0x711   : > { %v988_v36 = vrot.slane %v974_v33, %v3280_v27  ;;  %v989_v38 = vcombine.low %v966_v31, %v981_v34  ;;  %v990_v39 = vcombine.high %v966_v31, %v981_v34  ;;  %v1278_v31 = vld [vmem:[%s3620_s6 + $0x18] sm:$0xff]  ;;  %v1279_v34 = vld [vmem:[%s3620_s6 + $0x20] sm:$0xff] }
 0x712   : > { %v3002_v33 = vpack.c.bf16 %v1278_v31, %v1277_v30  ;;  %v2637_v31 = vld [vmem:[%s3616_s2 + $0x2b] ss:$0 sm:$0xff] }
 0x713   : > { %v997_v40 = vrot.slane %v989_v38, %v3284_v32  ;;  %v1004_v41 = vrot.slane %v990_v39, %v3284_v32  ;;  %v1005_v42 = vcombine.low %v973_v35, %v988_v36  ;;  %v1006_v43 = vcombine.high %v973_v35, %v988_v36  ;;  %v1280_v35 = vld [vmem:[%s3620_s6 + $0x28] sm:$0xff]  ;;  %v1281_v38 = vld [vmem:[%s3620_s6 + $0x30] sm:$0xff]  ;;  %v1282_v39 = vld [vmem:[%s3620_s6 + $0x38] sm:$0xff] }
 0x714   : > { %v3005_v36 = vpack.c.bf16 %v1280_v35, %v1279_v34 }
 0x715   : > { %v1013_v44 = vrot.slane %v1005_v42, %v3284_v32  ;;  %v1020_v45 = vrot.slane %v1006_v43, %v3284_v32  ;;  %v1025_v46 = vcombine.low %v997_v40, %v1004_v41  ;;  %v2622_v47 = vcombine.high %v997_v40, %v1004_v41  ;;  %v1283_v41 = vld [vmem:[%s3620_s6 + $0x40] sm:$0xff]  ;;  %v1284_v42 = vld [vmem:[%s3620_s6 + $0x48] sm:$0xff] }
 0x716   : > { %v3008_v40 = vpack.c.bf16 %v1282_v39, %v1281_v38  ;;  %v3011_v43 = vpack.c.bf16 %v1284_v42, %v1283_v41 }
 0x717   : > { %v1032_v48 = vrot.slane %v1025_v46, %v3280_v27  ;;  %v1040_v49 = vrot.slane %v2622_v47, %v3280_v27  ;;  %v1041_v50 = vcombine.low %v1013_v44, %v1020_v45  ;;  %v2623_v51 = vcombine.high %v1013_v44, %v1020_v45  ;;  %v1285_v44 = vld [vmem:[%s3620_s6 + $0x50] sm:$0xff]  ;;  %v1286_v45 = vld [vmem:[%s3620_s6 + $0x58] sm:$0xff]  ;;  %v1287_v47 = vld [vmem:[%s3620_s6 + $0x60] sm:$0xff] }
 0x718   : > { %v3014_v46 = vpack.c.bf16 %v1286_v45, %v1285_v44 }
 0x719   : > { %v1048_v52 = vrot.slane %v1041_v50, %v3280_v27  ;;  %v1056_v53 = vrot.slane %v2623_v51, %v3280_v27  ;;  %v1057_v54 = vcombine.low %v1032_v48, %v1040_v49  ;;  %v1288_v48 = vld [vmem:[%s3620_s6 + $0x68] sm:$0xff]  ;;  %v1289_v50 = vld [vmem:[%s3620_s6 + $0x70] sm:$0xff]  ;;  %v1290_v51 = vld [vmem:[%s3620_s6 + $0x78] sm:$0xff] }
 0x71a   : > { %v3017_v49 = vpack.c.bf16 %v1288_v48, %v1287_v47 }
 0x71b   : > { %v1065_v55 = vcombine.low %v1048_v52, %v1056_v53  ;;  %v1064_v56 = vrot.slane %v1057_v54, %v3284_v32  ;;  %v3020_v52 = vpack.c.bf16 %v1290_v51, %v1289_v50  ;;  %v2628_v53 = vld [vmem:[%s3616_s2 + $0x25] ss:$0 sm:$0xff] }
 0x71d   : > { %v1072_v57 = vrot.slane %v1065_v55, %v3284_v32 }
 0x71f   : > { %v1074_v58 = vcombine.high %v1064_v56, %v1072_v57  ;;  %v1073_v59 = vcombine.low %v1064_v56, %v1072_v57 }
 0x721   : > { %1076 = vrot.lane.b32.xlu0 %v1074_v58, %s3139_s15 }
 0x793   : > { %v1077_v60 = vpop.permute.xlu0 %1076 }
 0x794   : > { %v1079_v61 = vsel %vm479_vm2, %v1073_v59, %v1077_v60 }
 0x795   : > { %2823 = vmatmul.mubr.msk.f32.vlgmr.msra.gmra.mrb[4].mxu0 %vm291_vm0, %v1079_v61 }
 0x796   : > { %2833 = vmatprep.mubr.msk.f32.mxu0 %vm3132_vm1, %v3133_v13  ;;  %2994 = vmatpush3.bf16.msra.mxu0 %v2993_v12 }
 0x797   : > { %2995 = vmatprep.subr.bf16.mxu0 %v3131_v10 }
 0x868   : > { %v1157_v63 = vpop.f32.mrb[4].mxu0 }
 0x869   : > { %v1158_v0 = vadd.f32 %v2624_v62, %v1157_v63  ;;  %v2824_v1 = vpop.f32.mrb[5].mxu0 }
 0x86b   : > { %v1161_v2 = vadd.f32 %v1158_v0, %v3223_v23  ;;  %v1187_v23 = vld [vmem:[%s3619_s5 + $0x10] sm:$0xff] }
 0x86c   : > { %v2996_v15 = vpack.c.bf16 %v1188_v14, %v1187_v23  ;;  %v2633_v14 = vld [vmem:[%s3617_s3 + $0x20] sm:$0xff] }
 0x86d   : > { %v1162_v3 = vsel %vm291_vm0, %v1161_v2, 0.0 }
 0x86e   : > { %1163 = vadd.xlane.f32.xlu1 %v1162_v3  ;;  %2997 = vmatpush3.bf16.msra.mxu0 %v2996_v15  ;;  %v2634_v15 = vld [vmem:[%s3617_s3 + $0x28] sm:$0xff] }
 0x86f   : > { %2998 = vmatprep.subr.bf16.mxu0 %v3131_v10 }
 0x8fb   : > { %v1164_v4 = vpop.xlane.xlu1 %1163 }
 0x8fc   : > { %v1165_v5 = vmul.f32 0.03125, %v1164_v4 }
 0x8fe   : > { %v1166_v6 = vsub.f32 %v1161_v2, %v1165_v5  ;;  %v2630_v2 = vld [vmem:[%s3616_s2 + $0x26] ss:$0 sm:$0xff] }
 0x900   : > { %v1167_v7 = vmul.f32 %v1166_v6, %v1166_v6 }
 0x902   : > { %v1168_v8 = vsel %vm291_vm0, %v1167_v7, 0.0 }
 0x903   : > { %1169 = vadd.xlane.f32.xlu0 %v1168_v8 }
 0x990   : > { %v1170_v16 = vpop.xlane.xlu0 %1169 }
 0x991   : > { %v1171_v17 = vmul.f32 0.03125, %v1170_v16  ;;  %v3023_v16 = vpack.c.bf16 %v2634_v15, %v2633_v14 }
 0x993   : > { %v1172_v18 = vadd.f32 1e-12, %v1171_v17  ;;  %3024 = vmatpush3.bf16.msra.mxu1 %v3023_v16  ;;  %v2635_v17 = vld [vmem:[%s3617_s3 + $0x30] sm:$0xff] }
 0x994   : > { %3025 = vmatprep.subr.bf16.mxu1 %v3131_v10 }
 0x995   : > { %3103 = vrsqrt.f32 %v1172_v18  ;;  %v2636_v18 = vld [vmem:[%s3617_s3 + $0x38] sm:$0xff] }
 0x99f   : > { %v3104_v19 = vpop.eup %3103 }
 0x9a0   : > { %v1174_v21 = vmul.f32 %v3104_v19, %v1166_v6  ;;  %v3026_v19 = vpack.c.bf16 %v2636_v18, %v2635_v17  ;;  %v2649_v18 = vld [vmem:[%s3618_s4 + $0x20] sm:$0xff] }
 0x9a2   : > { %v1179_v26 = vmul.f32 %v2626_v20, %v1174_v21  ;;  %3027 = vmatpush3.bf16.msra.mxu1 %v3026_v19  ;;  %v2650_v19 = vld [vmem:[%s3618_s4 + $0x28] sm:$0xff] }
 0x9a3   : > { %3028 = vmatprep.subr.bf16.mxu1 %v3131_v10 }
 0x9a4   : > { %v1184_v29 = vadd.f32 %v2627_v25, %v1179_v26  ;;  %v2631_v25 = vld [vmem:[%s3616_s2 + $0x29] ss:$0 sm:$0xff] }
 0x9a6   : > { %2834 = vmatmul.mubr.msk.f32.vlgmr.msra.gmra.mrb[6].mxu0 %vm291_vm0, %v1184_v29 }
 0x9a7   : > { %3000 = vmatpush3.bf16.msra.mxu0 %v2999_v28  ;;  %2868 = vmatprep.mubr.msk.f32.mxu0 %vm3132_vm1, %v3133_v13  ;;  %v2632_v28 = vld [vmem:[%s3616_s2 + $0x2a] ss:$0 sm:$0xff] }
 0x9a8   : > { %3001 = vmatprep.subr.bf16.mxu0 %v3131_v10 }
 0x9ab   : > { %3003 = vmatpush3.bf16.msra.mxu0 %v3002_v33 }
 0x9ac   : > { %3004 = vmatprep.subr.bf16.mxu0 %v3131_v10 }
 0x9af   : > { %3006 = vmatpush3.bf16.msra.mxu0 %v3005_v36 }
 0x9b0   : > { %3007 = vmatprep.subr.bf16.mxu0 %v3131_v10 }
 0x9b3   : > { %3009 = vmatpush3.bf16.msra.mxu0 %v3008_v40 }
 0x9b4   : > { %3010 = vmatprep.subr.bf16.mxu0 %v3131_v10 }
 0x9b7   : > { %3012 = vmatpush3.bf16.msra.mxu0 %v3011_v43 }
 0x9b8   : > { %3013 = vmatprep.subr.bf16.mxu0 %v3131_v10 }
 0x9bb   : > { %3015 = vmatpush3.bf16.msra.mxu0 %v3014_v46 }
 0x9bc   : > { %3016 = vmatprep.subr.bf16.mxu0 %v3131_v10 }
 0x9bf   : > { %3018 = vmatpush3.bf16.msra.mxu0 %v3017_v49 }
 0x9c0   : > { %3019 = vmatprep.subr.bf16.mxu0 %v3131_v10 }
 0x9c3   : > { %3021 = vmatpush3.bf16.msra.mxu0 %v3020_v52 }
 0x9c4   : > { %3040 = vmatprep.subr.bf16.mxu0 %v3131_v10 }
 0xa79   : > { %v1262_v54 = vpop.f32.mrb[6].mxu0 }
 0xa7a   : > { %v1263_v55 = vadd.f32 %v2628_v53, %v1262_v54  ;;  %v2835_v56 = vpop.f32.mrb[7].mxu0 }
 0xa7c   : > { %v1266_v57 = vmul.f32 %v1263_v55, %v1263_v55 }
 0xa7e   : > { %v1267_v58 = vmul.f32 %v1266_v57, %v1263_v55 }
 0xa80   : > { %v1268_v59 = vmul.f32 0.044715, %v1267_v58 }
 0xa82   : > { %v1269_v60 = vadd.f32 %v1268_v59, %v1263_v55 }
 0xa84   : > { %v1270_v61 = vmul.f32 0.7978846, %v1269_v60 }
 0xa86   : > { %3105 = vtanh.f32 %v1270_v61 }
 0xa90   : > { %v3106_v62 = vpop.eup %3105 }
 0xa91   : > { %v1272_v63 = vadd.f32 1.0, %v3106_v62 }
 0xa93   : > { %v1273_v0 = vmul.f32 0.5, %v1272_v63 }
 0xa95   : > { %v1274_v1 = vmul.f32 %v1273_v0, %v1263_v55 }
 0xa97   : > { %2869 = vmatmul.mubr.f32.vlgmr.msra.gmra.mrb[8].mxu0 %v1274_v1 }
 0xa98   : > { %2925 = vmatprep.mubr.msk.f32.mxu0 %vm3132_vm1, %v3133_v13 }
 0xb6a   : > { %v1361_v3 = vpop.f32.mrb[8].mxu0 }
 0xb6b   : > { %v1362_v4 = vadd.f32 %v2630_v2, %v1361_v3  ;;  %v2870_v5 = vpop.f32.mrb[9].mxu0 }
 0xb6d   : > { %v1365_v6 = vadd.f32 %v1362_v4, %v1184_v29 }
 0xb6f   : > { %v1366_v7 = vsel %vm291_vm0, %v1365_v6, 0.0 }
 0xb70   : > { %1367 = vadd.xlane.f32.xlu1 %v1366_v7 }
 0xbfd   : > { %v1368_v8 = vpop.xlane.xlu1 %1367 }
 0xbfe   : > { %v1369_v9 = vmul.f32 0.03125, %v1368_v8 }
 0xc00   : > { %v1370_v11 = vsub.f32 %v1365_v6, %v1369_v9 }
 0xc02   : > { %v1371_v12 = vmul.f32 %v1370_v11, %v1370_v11 }
 0xc04   : > { %v1372_v23 = vsel %vm291_vm0, %v1371_v12, 0.0 }
 0xc05   : > { %1373 = vadd.xlane.f32.xlu1 %v1372_v23 }
 0xc92   : > { %v1374_v20 = vpop.xlane.xlu1 %1373 }
 0xc93   : > { %v1375_v21 = vmul.f32 0.03125, %v1374_v20  ;;  %v2651_v20 = vld [vmem:[%s3618_s4 + $0x30] sm:$0xff] }
 0xc95   : > { %v1376_v22 = vadd.f32 1e-12, %v1375_v21  ;;  %v3035_v21 = vpack.c.bf16 %v2650_v19, %v2649_v18  ;;  %v2655_v18 = vld [vmem:[%s3616_s2 + $0x2f] ss:$0 sm:$0xff] }
 0xc97   : > { %3107 = vrsqrt.f32 %v1376_v22  ;;  %v2652_v22 = vld [vmem:[%s3618_s4 + $0x38] sm:$0xff] }
 0xca1   : > { %v3108_v24 = vpop.eup %3107 }
 0xca2   : > { %v1378_v26 = vmul.f32 %v3108_v24, %v1370_v11  ;;  %v3038_v24 = vpack.c.bf16 %v2652_v22, %v2651_v20  ;;  %v2656_v20 = vld [vmem:[%s3616_s2 + $0x30] ss:$0 sm:$0xff] }
 0xca4   : > { %v1383_v29 = vmul.f32 %v2631_v25, %v1378_v26 }
 0xca6   : > { %v3420_v30 = vadd.f32 %v2632_v28, %v1383_v29 }
 0xca8   : > { %2880 = vmatmul.mubr.msk.f32.vlgmr.msra.gmra.mrb[6].mxu1 %vm291_vm0, %v3420_v30 }
 0xca9   : > { %2886 = vmatprep.mubr.msk.f32.mxu1 %vm3132_vm1, %v3133_v13 }
 0xd7b   : > { %v1475_v33 = vpop.f32.mrb[6].mxu1 }
 0xd7c   : > { %v1476_v34 = vadd.f32 %v2637_v31, %v1475_v33  ;;  %v2881_v35 = vpop.f32.mrb[7].mxu1 }
 0xd7e   : > { %1480 = vrot.lane.b32.xlu1 %v1476_v34, %s3134_s21 }
 0xd82   : > { %1482 = vrot.lane.b32.xlu1 %v1476_v34, %s3135_s22 }
 0xdf0   : > { %v1481_v36 = vpop.permute.xlu1 %1480 }
 0xdf1   : > { %1484 = vrot.lane.b32.xlu1 %v1481_v36, %s3135_s22 }
 0xdf4   : > { %v1483_v38 = vpop.permute.xlu1 %1482 }
 0xdf5   : > { %1488 = vxpose.xlu0.b32.start.end [1/1] (short) (narrow) %v1483_v38, 16 }
 0xe63   : > { %v1485_v39 = vpop.permute.xlu1 %1484 }
 0xe64   : > { %1520 = vxpose.xlu1.b32.start.end [1/1] (short) (narrow) %v1485_v39, 16 }
 0xe75   : > { %v1504_v40 = vpop.trf.xlu0 }
 0xe79   : > { %v1505_v41 = vpop.trf.xlu0 }
 0xe7a   : > { %v3029_v42 = vpack.c.bf16 %v1505_v41, %v1504_v40 }
 0xe7c   : > { %3030 = vmatpush3.bf16.msra.mxu1 %v3029_v42 }
 0xe7d   : > { %3031 = vmatprep.subr.bf16.mxu1 %v3131_v10 }
 0xe7f   : > { %2887 = vmatmul.mubr.msk.f32.vlgmr.msra.gmra.mrb[8].mxu1 %vm479_vm2, %v1476_v34 }
 0xe80   : > { %2893 = vmatprep.mubr.msk.f32.mxu1 %vm3132_vm1, %v3133_v13 }
 0xee4   : > { %v1536_v43 = vpop.trf.xlu1 }
 0xee8   : > { %v1537_v44 = vpop.trf.xlu1 }
 0xee9   : > { %v3032_v45 = vpack.c.bf16 %v1537_v44, %v1536_v43 }
 0xeeb   : > { %3033 = vmatpush3.bf16.msra.mxu1 %v3032_v45 }
 0xeee   : > { %2894 = vmatmul.mubr.msk.f32.vlgmr.msra.gmra.mrb[10].mxu1 %vm479_vm2, %v1481_v36 }
 0xf52   : > { %v1620_v46 = vpop.f32.mrb[8].mxu1 }
 0xf53   : > { %v1696_v47 = vmul.f32 0.25, %v1620_v46  ;;  %v2888_v48 = vpop.f32.mrb[9].mxu1 }
 0xf55   : > { %v1698_v49 = vadd.f32 %v3242_v37, %v1696_v47 }
 0xf57   : > { %v1700_v50 = vsel %vm634_vm3, %v1698_v49, -inf }
 0xf58   : > { %1701 = vmax.xlane.f32.xlu1 %v1700_v50 }
 0xf69   : > { %1722 = vrot.lane.b32.xlu1 %v1476_v34, %s3136_s29 }
 0xfc1   : > { %v1692_v51 = vpop.f32.mrb[10].mxu1 }
 0xfc2   : > { %v1697_v52 = vmul.f32 0.25, %v1692_v51  ;;  %v2895_v53 = vpop.f32.mrb[11].mxu1 }
 0xfc4   : > { %v1699_v54 = vadd.f32 %v3242_v37, %v1697_v52 }
 0xfc6   : > { %v1703_v55 = vsel %vm634_vm3, %v1699_v54, -inf }
 0xfc7   : > { %1704 = vmax.xlane.f32.xlu0 %v1703_v55 }
 0xfdd   : > { %1724 = vrot.lane.b32.xlu0 %v1481_v36, %s3136_s29 }
 0xfe5   : > { %v1702_v56 = vpop.xlane.xlu1 %1701 }
 0xfe6   : > { %v1706_v57 = vsub.f32 %v1698_v49, %v1702_v56 }
 0xfe8   : > { %v1708_v58 = vmul.f32 1.442695, %v1706_v57 }
 0xfe9   : > { %v1723_v61 = vpop.permute.xlu1 %1722 }
 0xfea   : > { %3109 = vpow2.f32 %v1708_v58 }
 0xff4   : > { %v3110_v59 = vpop.eup %3109 }
 0xff5   : > { %v1712_v60 = vsel %vm634_vm3, %v3110_v59, 0.0 }
 0xff6   : > { %1713 = vadd.xlane.f32.xlu1 %v1712_v60 }
0x1029   : > { %1728 = vxpose.xlu1.b32.start.end [1/1] (short) (narrow) %v1723_v61, 16 }
0x1054   : > { %v1705_v62 = vpop.xlane.xlu0 %1704 }
0x1055   : > { %v1707_v63 = vsub.f32 %v1699_v54, %v1705_v62 }
0x1057   : > { %v1710_v0 = vmul.f32 1.442695, %v1707_v63 }
0x1058   : > { %v1725_v5 = vpop.permute.xlu0 %1724 }
0x1059   : > { %3111 = vpow2.f32 %v1710_v0 }
0x1063   : > { %v3112_v37 = vpop.eup %3111 }
0x1064   : > { %v1715_v1 = vsel %vm634_vm3, %v3112_v37, 0.0 }
0x1065   : > { %1716 = vadd.xlane.f32.xlu0 %v1715_v1 }
0x1083   : > { %v1714_v2 = vpop.xlane.xlu1 %1713 }
0x1084   : > { %3113 = vrcp.f32 %v1714_v2 }
0x108e   : > { %v3114_v3 = vpop.eup %3113 }
0x108f   : > { %v1719_v4 = vmul.f32 %v3114_v3, %v3110_v59 }
0x1091   : > { %2896 = vmatprep.subr.msk.mxu1 %vm634_vm3, %v1719_v4 }
0x1092   : > { %2897 = vmatpush3.xpose.msk.msra.mxu1 %vm634_vm3, %v1719_v4  ;;  %1760 = vxpose.xlu0.b32.start.end [1/1] (short) (narrow) %v1725_v5, 16  ;;  %v2657_v5 = vld [vmem:[%s3619_s5 + $0x20] sm:$0xff] }
0x10a9   : > { %v1744_v6 = vpop.trf.xlu1 }
0x10aa   : > { %2898 = vmatprep.mubr.msk.f32.mxu1 %vm634_vm3, %v1744_v6  ;;  %v2658_v6 = vld [vmem:[%s3619_s5 + $0x28] sm:$0xff] }
0x10ad   : > { %v1745_v7 = vpop.trf.xlu1 }
0x10ae   : > { %2899 = vmatmul.mubr.msk.f32.vlgmr.msra.gmra.mrb[12].mxu1 %vm634_vm3, %v1745_v7  ;;  %v3041_v7 = vpack.c.bf16 %v2658_v6, %v2657_v5  ;;  %v2457_v5 = vld [vmem:[%s3616_s2] sm:$0xff]  ;;  %v2458_v6 = vld [vmem:[%s3616_s2 + $0x8] sm:$0xff] }
0x10b0   : > { %3042 = vmatpush3.bf16.msra.mxu0 %v3041_v7  ;;  %v3071_v7 = vpack.c.bf16 %v2458_v6, %v2457_v5 }
0x10b1   : > { %3043 = vmatprep.subr.bf16.mxu0 %v3131_v10 }
0x10f2   : > { %v1717_v8 = vpop.xlane.xlu0 %1716 }
0x10f3   : > { %3115 = vrcp.f32 %v1717_v8  ;;  %v2660_v8 = vld [vmem:[%s3619_s5 + $0x38] sm:$0xff] }
0x10fd   : > { %v3116_v9 = vpop.eup %3115 }
0x10fe   : > { %v1721_v11 = vmul.f32 %v3116_v9, %v3112_v37 }
0x1100   : > { %2901 = vmatprep.subr.msk.mxu1 %vm634_vm3, %v1721_v11 }
0x1101   : > { %2902 = vmatpush3.xpose.msk.msra.mxu1 %vm634_vm3, %v1721_v11  ;;  %v2663_v11 = vld [vmem:[%s3620_s6 + $0x80] sm:$0xff] }
0x1102   : > { %3034 = vmatprep.subr.bf16.mxu1 %v3131_v10 }
0x1112   : > { %v1776_v12 = vpop.trf.xlu0 }
0x1113   : > { %2903 = vmatprep.mubr.msk.f32.mxu1 %vm634_vm3, %v1776_v12  ;;  %v2664_v12 = vld [vmem:[%s3620_s6 + $0x88] sm:$0xff] }
0x1116   : > { %v1777_v23 = vpop.trf.xlu0 }
0x1117   : > { %2904 = vmatmul.mubr.msk.f32.vlgmr.msra.gmra.mrb[14].mxu1 %vm634_vm3, %v1777_v23  ;;  %v3047_v23 = vpack.c.bf16 %v2664_v12, %v2663_v11 }
0x1118   : > { %2914 = vmatprep.mubr.msk.f32.mxu1 %vm3132_vm1, %v3133_v13  ;;  %3036 = vmatpush3.bf16.msra.mxu1 %v3035_v21 }
0x1119   : > { %3037 = vmatprep.subr.bf16.mxu1 %v3131_v10 }
0x111c   : > { %3039 = vmatpush3.bf16.msra.mxu1 %v3038_v24  ;;  %v2665_v24 = vld [vmem:[%s3620_s6 + $0x90] sm:$0xff] }
0x111d   : > { %3046 = vmatprep.subr.bf16.mxu1 %v3131_v10 }
0x1181   : > { %v2900_v14 = vpop.f32.mrb[12].mxu1 }
0x1182   : > { %v1867_v15 = vpop.f32.mrb[13].mxu1 }
0x1183   : > { %1960 = vxpose.xlu1.b32.start [1/2] (short) (narrow) %v1867_v15, 8 }
0x1187   : > { %1961 = vxpose.xlu1.b32.end [2/2] (short) (narrow) %v2900_v14, 8 }
0x11ea   : > { %v2905_v16 = vpop.f32.mrb[14].mxu1 }
0x11eb   : > { %v1951_v17 = vpop.f32.mrb[15].mxu1 }
0x11ec   : > { %1992 = vxpose.xlu0.b32.start [1/2] (short) (narrow) %v1951_v17, 8 }
0x11f0   : > { %1993 = vxpose.xlu0.b32.end [2/2] (short) (narrow) %v2905_v16, 8 }
0x1203   : > { %v1976_v25 = vpop.trf.xlu1 }
0x1204   : > { %v2024_v26 = vcombine.high %v1976_v25, %v3133_v13  ;;  %v2031_v28 = vrot.slane %v1976_v25, %v3280_v27  ;;  %v2666_v25 = vld [vmem:[%s3620_s6 + $0x98] sm:$0xff] }
0x1206   : > { %v2038_v31 = vrot.slane %v2024_v26, %v3280_v27  ;;  %v3050_v26 = vpack.c.bf16 %v2666_v25, %v2665_v24 }
0x126c   : > { %v2008_v29 = vpop.trf.xlu0 }
0x126d   : > { %v2039_v33 = vcombine.high %v2008_v29, %v3133_v13  ;;  %v2046_v34 = vrot.slane %v2008_v29, %v3280_v27 }
0x126f   : > { %v2053_v35 = vrot.slane %v2039_v33, %v3280_v27  ;;  %v2054_v36 = vcombine.low %v2031_v28, %v2046_v34  ;;  %v2055_v38 = vcombine.high %v2031_v28, %v2046_v34  ;;  %v2667_v28 = vld [vmem:[%s3620_s6 + $0xa0] sm:$0xff]  ;;  %v2670_v33 = vld [vmem:[%s3620_s6 + $0xb8] sm:$0xff] }
0x1271   : > { %v2062_v39 = vrot.slane %v2054_v36, %v3284_v32  ;;  %v2069_v40 = vrot.slane %v2055_v38, %v3284_v32  ;;  %v2070_v41 = vcombine.low %v2038_v31, %v2053_v35  ;;  %v2071_v42 = vcombine.high %v2038_v31, %v2053_v35  ;;  %v2669_v31 = vld [vmem:[%s3620_s6 + $0xb0] sm:$0xff]  ;;  %v2671_v35 = vld [vmem:[%s3620_s6 + $0xc0] sm:$0xff]  ;;  %v2672_v36 = vld [vmem:[%s3620_s6 + $0xc8] sm:$0xff] }
0x1272   : > { %v3056_v34 = vpack.c.bf16 %v2670_v33, %v2669_v31  ;;  %v3059_v38 = vpack.c.bf16 %v2672_v36, %v2671_v35 }
0x1273   : > { %v2078_v43 = vrot.slane %v2070_v41, %v3284_v32  ;;  %v2085_v44 = vrot.slane %v2071_v42, %v3284_v32  ;;  %v2090_v45 = vcombine.low %v2062_v39, %v2069_v40  ;;  %v2647_v46 = vcombine.high %v2062_v39, %v2069_v40  ;;  %v2673_v39 = vld [vmem:[%s3620_s6 + $0xd0] sm:$0xff]  ;;  %v2674_v40 = vld [vmem:[%s3620_s6 + $0xd8] sm:$0xff]  ;;  %v2675_v42 = vld [vmem:[%s3620_s6 + $0xe0] sm:$0xff] }
0x1274   : > { %v3062_v41 = vpack.c.bf16 %v2674_v40, %v2673_v39 }
0x1275   : > { %v2097_v47 = vrot.slane %v2090_v45, %v3280_v27  ;;  %v2105_v48 = vrot.slane %v2647_v46, %v3280_v27  ;;  %v2106_v49 = vcombine.low %v2078_v43, %v2085_v44  ;;  %v2648_v50 = vcombine.high %v2078_v43, %v2085_v44  ;;  %v2676_v43 = vld [vmem:[%s3620_s6 + $0xe8] sm:$0xff]  ;;  %v2677_v45 = vld [vmem:[%s3620_s6 + $0xf0] sm:$0xff]  ;;  %v2678_v46 = vld [vmem:[%s3620_s6 + $0xf8] sm:$0xff] }
0x1276   : > { %v3065_v44 = vpack.c.bf16 %v2676_v43, %v2675_v42 }
0x1277   : > { %v2113_v51 = vrot.slane %v2106_v49, %v3280_v27  ;;  %v2121_v52 = vrot.slane %v2648_v50, %v3280_v27  ;;  %v2122_v53 = vcombine.low %v2097_v47, %v2105_v48  ;;  %v2653_v27 = vld [vmem:[%s3616_s2 + $0x2c] ss:$0 sm:$0xff]  ;;  %v3068_v47 = vpack.c.bf16 %v2678_v46, %v2677_v45  ;;  %v2661_v48 = vld [vmem:[%s3616_s2 + $0x2d] ss:$0 sm:$0xff] }
0x1279   : > { %v2130_v54 = vcombine.low %v2113_v51, %v2121_v52  ;;  %v2129_v55 = vrot.slane %v2122_v53, %v3284_v32 }
0x127b   : > { %v2137_v56 = vrot.slane %v2130_v54, %v3284_v32 }
0x127d   : > { %v2139_v57 = vcombine.high %v2129_v55, %v2137_v56  ;;  %v2138_v58 = vcombine.low %v2129_v55, %v2137_v56 }
0x127f   : > { %2141 = vrot.lane.b32.xlu1 %v2139_v57, %s3139_s15 }
0x12f1   : > { %v2142_v59 = vpop.permute.xlu1 %2141 }
0x12f2   : > { %v2144_v60 = vsel %vm479_vm2, %v2138_v58, %v2142_v59 }
0x12f3   : > { %2915 = vmatmul.mubr.msk.f32.vlgmr.msra.gmra.mrb[16].mxu1 %vm291_vm0, %v2144_v60 }
0x12f4   : > { %2960 = vmatprep.mubr.msk.f32.mxu1 %vm3132_vm1, %v3133_v13  ;;  %3048 = vmatpush3.bf16.msra.mxu1 %v3047_v23 }
0x12f5   : > { %3049 = vmatprep.subr.bf16.mxu1 %v3131_v10 }
0x12f8   : > { %3051 = vmatpush3.bf16.msra.mxu1 %v3050_v26 }
0x12f9   : > { %3052 = vmatprep.subr.bf16.mxu1 %v3131_v10 }
0x13c6   : > { %v2223_v61 = vpop.f32.mrb[16].mxu1 }
0x13c7   : > { %v2224_v62 = vadd.f32 %v2653_v27, %v2223_v61  ;;  %v2916_v63 = vpop.f32.mrb[17].mxu1  ;;  %v2679_v27 = vld [vmem:[%s3616_s2 + $0x2e] ss:$0 sm:$0xff] }
0x13c9   : > { %v2227_v32 = vadd.f32 %v2224_v62, %v3420_v30  ;;  %v2659_v30 = vld [vmem:[%s3619_s5 + $0x30] sm:$0xff] }
0x13ca   : > { %v3044_v9 = vpack.c.bf16 %v2660_v8, %v2659_v30  ;;  %v2459_v30 = vld [vmem:[%s3616_s2 + $0x10] sm:$0xff]  ;;  %v2460_v8 = vld [vmem:[%s3616_s2 + $0x18] sm:$0xff] }
0x13cb   : > { %v2228_v0 = vsel %vm291_vm0, %v2227_v32, 0.0 }
0x13cc   : > { %2229 = vadd.xlane.f32.xlu0 %v2228_v0  ;;  %3045 = vmatpush3.bf16.msra.mxu0 %v3044_v9  ;;  %v3074_v9 = vpack.c.bf16 %v2460_v8, %v2459_v30 }
0x13cd   : > { %3070 = vmatprep.subr.bf16.mxu0 %v3131_v10 }
0x1459   : > { %v2230_v37 = vpop.xlane.xlu0 %2229 }
0x145a   : > { %v2231_v1 = vmul.f32 0.03125, %v2230_v37 }
0x145c   : > { %v2232_v2 = vsub.f32 %v2227_v32, %v2231_v1 }
0x145e   : > { %v2233_v3 = vmul.f32 %v2232_v2, %v2232_v2 }
0x1460   : > { %v2234_v4 = vsel %vm291_vm0, %v2233_v3, 0.0 }
0x1461   : > { %2235 = vadd.xlane.f32.xlu1 %v2234_v4 }
0x14ee   : > { %v2236_v14 = vpop.xlane.xlu1 %2235 }
0x14ef   : > { %v2237_v15 = vmul.f32 0.03125, %v2236_v14 }
0x14f1   : > { %v2238_v16 = vadd.f32 1e-12, %v2237_v15 }
0x14f3   : > { %3117 = vrsqrt.f32 %v2238_v16  ;;  %v2681_v16 = vld [vmem:[%s3616_s2 + $0x32] ss:$0 sm:$0xff] }
0x14fd   : > { %v3118_v17 = vpop.eup %3117 }
0x14fe   : > { %v2240_v19 = vmul.f32 %v3118_v17, %v2232_v2 }
0x1500   : > { %v2245_v21 = vmul.f32 %v2655_v18, %v2240_v19  ;;  %v2682_v19 = vld [vmem:[%s3616_s2 + $0x20] ss:$0 sm:$0xff] }
0x1502   : > { %v2250_v22 = vadd.f32 %v2656_v20, %v2245_v21 }
0x1504   : > { %2926 = vmatmul.mubr.msk.f32.vlgmr.msra.gmra.mrb[10].mxu0 %vm291_vm0, %v2250_v22 }
0x1505   : > { %2971 = vmatprep.mubr.msk.f32.mxu0 %vm3132_vm1, %v3133_v13  ;;  %v2668_v13 = vld [vmem:[%s3620_s6 + $0xa8] sm:$0xff]  ;;  %3072 = vmatpush3.bf16.msra.mxu0 %v3071_v7 }
0x1506   : > { %v3053_v29 = vpack.c.bf16 %v2668_v13, %v2667_v28  ;;  %3073 = vmatprep.subr.bf16.mxu0 %v3131_v10 }
0x1508   : > { %3054 = vmatpush3.bf16.msra.mxu1 %v3053_v29 }
0x1509   : > { %3055 = vmatprep.subr.bf16.mxu1 %v3131_v10  ;;  %3075 = vmatpush3.bf16.msra.mxu0 %v3074_v9 }
0x150c   : > { %3057 = vmatpush3.bf16.msra.mxu1 %v3056_v34 }
0x150d   : > { %3058 = vmatprep.subr.bf16.mxu1 %v3131_v10 }
0x1510   : > { %3060 = vmatpush3.bf16.msra.mxu1 %v3059_v38 }
0x1511   : > { %3061 = vmatprep.subr.bf16.mxu1 %v3131_v10 }
0x1514   : > { %3063 = vmatpush3.bf16.msra.mxu1 %v3062_v41 }
0x1515   : > { %3064 = vmatprep.subr.bf16.mxu1 %v3131_v10 }
0x1518   : > { %3066 = vmatpush3.bf16.msra.mxu1 %v3065_v44 }
0x1519   : > { %3067 = vmatprep.subr.bf16.mxu1 %v3131_v10  ;;  %v2680_v10 = vld [vmem:[%s3616_s2 + $0x31] ss:$0 sm:$0xff] }
0x151c   : > { %3069 = vmatpush3.bf16.msra.mxu1 %v3068_v47 }
0x15d7   : > { %v2329_v49 = vpop.f32.mrb[10].mxu0 }
0x15d8   : > { %v2330_v50 = vadd.f32 %v2661_v48, %v2329_v49  ;;  %v2927_v51 = vpop.f32.mrb[11].mxu0 }
0x15da   : > { %v2333_v52 = vmul.f32 %v2330_v50, %v2330_v50 }
0x15dc   : > { %v2334_v53 = vmul.f32 %v2333_v52, %v2330_v50 }
0x15de   : > { %v2335_v54 = vmul.f32 0.044715, %v2334_v53 }
0x15e0   : > { %v2336_v55 = vadd.f32 %v2335_v54, %v2330_v50 }
0x15e2   : > { %v2337_v56 = vmul.f32 0.7978846, %v2336_v55 }
0x15e4   : > { %3119 = vtanh.f32 %v2337_v56 }
0x15ee   : > { %v3120_v57 = vpop.eup %3119 }
0x15ef   : > { %v2339_v58 = vadd.f32 1.0, %v3120_v57 }
0x15f1   : > { %v2340_v59 = vmul.f32 0.5, %v2339_v58 }
0x15f3   : > { %v2341_v60 = vmul.f32 %v2340_v59, %v2330_v50 }
0x15f5   : > { %2961 = vmatmul.mubr.f32.vlgmr.msra.gmra.mrb[18].mxu1 %v2341_v60 }
0x16c8   : > { %v2429_v61 = vpop.f32.mrb[18].mxu1 }
0x16c9   : > { %v2430_v62 = vadd.f32 %v2679_v27, %v2429_v61  ;;  %v2962_v63 = vpop.f32.mrb[19].mxu1 }
0x16cb   : > { %v2433_v32 = vadd.f32 %v2430_v62, %v2250_v22 }
0x16cd   : > { %v2434_v0 = vsel %vm291_vm0, %v2433_v32, 0.0 }
0x16ce   : > { %2435 = vadd.xlane.f32.xlu0 %v2434_v0 }
0x175b   : > { %v2436_v37 = vpop.xlane.xlu0 %2435 }
0x175c   : > { %v2437_v1 = vmul.f32 0.03125, %v2436_v37 }
0x175e   : > { %v2438_v2 = vsub.f32 %v2433_v32, %v2437_v1 }
0x1760   : > { %v2439_v3 = vmul.f32 %v2438_v2, %v2438_v2 }
0x1762   : > { %v2440_v4 = vsel %vm291_vm0, %v2439_v3, 0.0 }
0x1763   : > { %2441 = vadd.xlane.f32.xlu0 %v2440_v4 }
0x17f0   : > { %v2442_v11 = vpop.xlane.xlu0 %2441 }
0x17f1   : > { %v2443_v12 = vmul.f32 0.03125, %v2442_v11 }
0x17f3   : > { %v2444_v23 = vadd.f32 1e-12, %v2443_v12 }
0x17f5   : > { %3121 = vrsqrt.f32 %v2444_v23 }
0x17ff   : > { %v3122_v14 = vpop.eup %3121 }
0x1800   : > { %v2446_v15 = vmul.f32 %v3122_v14, %v2438_v2 }
0x1802   : > { %v2451_v17 = vmul.f32 %v2680_v10, %v2446_v15 }
0x1804   : > { %v2456_v18 = vadd.f32 %v2681_v16, %v2451_v17 }
0x1806   : > { %2972 = vmatmul.mubr.msk.f32.vlgmr.msra.gmra.mrb[12].mxu0 %vm291_vm0, %v2456_v18 }
0x18d9   : > { %v2535_v20 = vpop.f32.mrb[12].mxu0 }
0x18da   : > { %v2536_v21 = vadd.f32 %v2682_v19, %v2535_v20  ;;  %v2973_v22 = vpop.f32.mrb[13].mxu0 }
0x18dc   : > { %2539 = vst [vmem:[%s287_s9] sm:$0xff] %v2536_v21 }
0x18dd PF: > { %s17_s24 = sadd.s32 1, %s3129_s24  }
0x18de   : > { %p14_p4 = scmp.ge.s32.totalorder %s17_s24, 4  }
0x18e0   :  { %16 = sbr.rel (!%p14_p4) target bundleno = 1 (0x1), region = 85 }

</bundles_post_ra>
